<compile_context>
chip_gen: v7x
topology: tpu7x:2x2x1
jax: 0.10.0
libtpu: 0.0.40
codegen_flags: <defaults>
</compile_context>

<pallas_src>
import jax
import jax.numpy as jnp
from jax.experimental import pallas as pl
from jax.experimental.pallas import tpu as pltpu


def birdbrain_kernel(x_ref, a1_ref, a2_ref, a3_ref, b_ref, o_ref):
    # x_ref : (TR, 4P)  packed input tile (P samples per row, batch-major)
    # a*_ref: kron(I_P, W^T) block-diagonal weights, f32, VMEM-resident
    #         a1:(4P,10P)  a2:(10P,10P)  a3:(10P,2P)
    # b_ref : (8, 10P)  packed biases: row0 = tile(b1,P), row1 = tile(b2,P),
    #                   row2[:2P] = tile(b3,P)
    # o_ref : (TR, 2P)  packed output tile
    n_out = o_ref.shape[-1]
    x = x_ref[...].astype(jnp.float32)

    h = jnp.dot(x, a1_ref[...], preferred_element_type=jnp.float32)
    h = jnp.maximum(h + b_ref[0:1, :], 0.0)

    h = jnp.dot(h, a2_ref[...], preferred_element_type=jnp.float32)
    h = jnp.maximum(h + b_ref[1:2, :], 0.0)

    out = jnp.dot(h, a3_ref[...], preferred_element_type=jnp.float32)
    out = out + b_ref[2:3, :n_out]
    o_ref[...] = out.astype(o_ref.dtype)


def _cdiv(a, b):
    return (a + b - 1) // b


def _round_up(n, m):
    return _cdiv(n, m) * m


def birdbrain_forward(x, params, *, samples_per_row=64, batch_tile=65536,
                      io_dtype=None, use_kernel=None, min_grid_steps=4):
    """x: (B, 4) -> (B, 2). params are PyTorch-layout (out,in) weights + (out,) biases."""
    w1, b1, w2, b2, w3, b3 = params
    B = x.shape[0]

    if use_kernel is None:
        # Below a few tens of thousands of samples the fused XLA path wins on
        # launch + DMA-setup overhead (review: raise threshold from 4K to ~32K).
        use_kernel = B >= 32768
    if not use_kernel:
        out = reference_forward(x, params)
        return out.astype(x.dtype if io_dtype is None else io_dtype)

    io_dtype = jnp.dtype(x.dtype if io_dtype is None else io_dtype)
    P = int(samples_per_row)

    # ---- tile sizing over packed rows (each row = P samples, 4P features) ----
    ROW_QUANT = 16                       # sublane-dense for both f32 and bf16
    rows_needed = _cdiv(B, P)
    max_tile_rows = max(ROW_QUANT, (batch_tile // P) // ROW_QUANT * ROW_QUANT)
    # Cap the tile so large batches yield >= min_grid_steps grid steps (v7x
    # megacore needs >= 2 to use both TensorCores); never go below 16 rows.
    target_rows = _round_up(max(1, _cdiv(rows_needed, min_grid_steps)), ROW_QUANT)
    tile_rows = max(ROW_QUANT, min(max_tile_rows, target_rows))
    num_tiles = _cdiv(rows_needed, tile_rows)
    rows_pad = num_tiles * tile_rows
    b_pad = rows_pad * P

    # ---- input layout: FREE reshape; copy only when padding is required -----
    x_io = x.astype(io_dtype)
    if b_pad != B:
        x_io = jnp.zeros((b_pad, 4), io_dtype).at[:B, :].set(x_io)
    x_flat = x_io.reshape(rows_pad, 4 * P)

    # ---- block-diagonal weights / packed biases (built once, VMEM-resident) --
    eye = jnp.eye(P, dtype=jnp.float32)
    a1 = jnp.kron(eye, w1.T.astype(jnp.float32))      # (4P, 10P)
    a2 = jnp.kron(eye, w2.T.astype(jnp.float32))      # (10P, 10P)
    a3 = jnp.kron(eye, w3.T.astype(jnp.float32))      # (10P, 2P)
    bias = (jnp.zeros((8, 10 * P), jnp.float32)
            .at[0, :].set(jnp.tile(b1.astype(jnp.float32), P))
            .at[1, :].set(jnp.tile(b2.astype(jnp.float32), P))
            .at[2, :2 * P].set(jnp.tile(b3.astype(jnp.float32), P)))

    io_bytes = io_dtype.itemsize
    weight_bytes = 4 * (a1.size + a2.size + a3.size + bias.size)
    cost = pl.CostEstimate(
        flops=2 * b_pad * (4 * 10 + 10 * 10 + 10 * 2),   # ~320 flops / sample
        transcendentals=0,
        bytes_accessed=b_pad * 6 * io_bytes + weight_bytes,
    )

    out_flat = pl.pallas_call(
        birdbrain_kernel,
        out_shape=jax.ShapeDtypeStruct((rows_pad, 2 * P), io_dtype),
        grid=(num_tiles,),
        in_specs=[
            pl.BlockSpec((tile_rows, 4 * P), lambda i: (i, 0)),   # streamed x tile
            pl.BlockSpec(a1.shape, lambda i: (0, 0)),             # constant blocks:
            pl.BlockSpec(a2.shape, lambda i: (0, 0)),             #  VMEM-resident,
            pl.BlockSpec(a3.shape, lambda i: (0, 0)),             #  no per-step DMA
            pl.BlockSpec(bias.shape, lambda i: (0, 0)),
        ],
        out_specs=pl.BlockSpec((tile_rows, 2 * P), lambda i: (i, 0)),  # lane-dense
        compiler_params=pltpu.CompilerParams(
            dimension_semantics=("parallel",),        # megacore-shard the batch grid
            vmem_limit_bytes=32 * 1024 * 1024,        # safe on v5e/v6e, < v7x 64 MiB
        ),
        cost_estimate=cost,
    )(x_flat, a1, a2, a3, bias)

    # Free reshape back to per-sample layout; slice only if we padded.
    return out_flat.reshape(b_pad, 2)[:B]


def init_params(key):
    """Deterministic init matching nn.Linear defaults: W is (out, in), uniform ±1/sqrt(fan_in)."""
    dims = [(10, 4), (10, 10), (2, 10)]  # (out_features, in_features)
    params = []
    for i, (fan_out, fan_in) in enumerate(dims):
        kw, kb = jax.random.split(jax.random.fold_in(key, i))
        bound = 1.0 / jnp.sqrt(fan_in)
        w = jax.random.uniform(kw, (fan_out, fan_in), jnp.float32, -bound, bound)
        b = jax.random.uniform(kb, (fan_out,), jnp.float32, -bound, bound)
        params += [w, b]
    return tuple(params)


def reference_forward(x, params):
    w1, b1, w2, b2, w3, b3 = params
    h = jnp.maximum(x @ w1.T + b1, 0.0)
    h = jnp.maximum(h @ w2.T + b2, 0.0)
    return h @ w3.T + b3


if __name__ == "__main__":
    key = jax.random.PRNGKey(0)
    params = init_params(key)

    # Small deterministic batch (B=8, in_features=4), as the module's forward implies.
    x = jax.random.normal(jax.random.fold_in(key, 100), (8, 4), jnp.float32)
    ref = reference_forward(x, params)

    # f32 I/O path through the Pallas kernel (padding + single-tile grid).
    out = jax.block_until_ready(birdbrain_forward(x, params, use_kernel=True))
    assert out.shape == (8, 2), out.shape
    assert jnp.allclose(out, ref, atol=2e-2, rtol=2e-2), "f32 kernel mismatch vs reference"

    # bf16 I/O path (dense packed layout -> genuinely halved HBM traffic; f32 accumulation).
    out_bf16 = jax.block_until_ready(
        birdbrain_forward(x, params, io_dtype=jnp.bfloat16, use_kernel=True))
    assert out_bf16.shape == (8, 2)
    assert jnp.allclose(out_bf16.astype(jnp.float32), ref, atol=1e-1, rtol=1e-1), \
        "bf16 kernel mismatch vs reference"

    # Multi-tile grid: B=4096 -> 64 packed rows -> 4 tiles of 16 rows, zero padding,
    # exercises software pipelining and the parallel batch grid with free reshapes only.
    xb = jax.random.normal(jax.random.fold_in(key, 200), (4096, 4), jnp.float32)
    out_b = jax.block_until_ready(
        birdbrain_forward(xb, params, batch_tile=1024, use_kernel=True))
    ref_b = reference_forward(xb, params)
    assert out_b.shape == (4096, 2)
    assert jnp.allclose(out_b, ref_b, atol=2e-2, rtol=2e-2), "tiled kernel mismatch vs reference"

    # Non-multiple batch (B=1000) exercises the pad + output-slice path.
    xc = jax.random.normal(jax.random.fold_in(key, 300), (1000, 4), jnp.float32)
    out_c = jax.block_until_ready(birdbrain_forward(xc, params, use_kernel=True))
    ref_c = reference_forward(xc, params)
    assert out_c.shape == (1000, 2)
    assert jnp.allclose(out_c, ref_c, atol=2e-2, rtol=2e-2), "padded kernel mismatch vs reference"

    print("KERNEL_OK")
</pallas_src>

<mosaic_0001>
module attributes {stable_mosaic.version = 11 : i64} {
  func.func @birdbrain_kernel(%arg0: i32, %arg1: memref<16x256xf32, #tpu.memory_space<vmem>>, %arg2: memref<256x640xf32, #tpu.memory_space<vmem>>, %arg3: memref<640x640xf32, #tpu.memory_space<vmem>>, %arg4: memref<640x128xf32, #tpu.memory_space<vmem>>, %arg5: memref<8x640xf32, #tpu.memory_space<vmem>>, %arg6: memref<16x128xf32, #tpu.memory_space<vmem>>) attributes {dimension_semantics = [#tpu.dimension_semantics<parallel>], iteration_bounds = array<i64: 1>, scalar_prefetch = 0 : i64, scratch_operands = 0 : i64, tpu.core_type = #tpu.core_type<tc>, window_params = [{transform_indices = @transform_0, window_bounds = array<i64: 16, 256>}, {pipeline_mode = #tpu.pipeline_mode<synchronous>, transform_indices = @transform_1, window_bounds = array<i64: 256, 640>}, {pipeline_mode = #tpu.pipeline_mode<synchronous>, transform_indices = @transform_2, window_bounds = array<i64: 640, 640>}, {pipeline_mode = #tpu.pipeline_mode<synchronous>, transform_indices = @transform_3, window_bounds = array<i64: 640, 128>}, {pipeline_mode = #tpu.pipeline_mode<synchronous>, transform_indices = @transform_4, window_bounds = array<i64: 8, 640>}, {transform_indices = @transform_5, window_bounds = array<i64: 16, 128>}]} {
    %c0 = arith.constant 0 : index
    %c0_0 = arith.constant 0 : index
    %0 = vector.load %arg1[%c0, %c0_0] : memref<16x256xf32, #tpu.memory_space<vmem>>, vector<16x256xf32>
    %c0_1 = arith.constant 0 : index
    %c0_2 = arith.constant 0 : index
    %1 = vector.load %arg2[%c0_1, %c0_2] : memref<256x640xf32, #tpu.memory_space<vmem>>, vector<256x640xf32>
    %cst = arith.constant dense<0.000000e+00> : vector<16x640xf32>
    %2 = tpu.matmul %0, %1, %cst {dimension_numbers = #tpu.dot_dimension_numbers<[1], [0], [0], [1], [0, 0, 1, 1], [], []>} : vector<16x256xf32>, vector<256x640xf32>, vector<16x640xf32> -> vector<16x640xf32>
    %c0_3 = arith.constant 0 : index
    %c0_4 = arith.constant 0 : index
    %3 = vector.load %arg5[%c0_3, %c0_4] : memref<8x640xf32, #tpu.memory_space<vmem>>, vector<1x640xf32>
    %4 = vector.broadcast %3 : vector<1x640xf32> to vector<16x640xf32>
    %5 = arith.addf %2, %4 : vector<16x640xf32>
    %cst_5 = arith.constant 0.000000e+00 : f32
    %6 = vector.broadcast %cst_5 : f32 to vector<16x640xf32>
    %7 = arith.maximumf %5, %6 : vector<16x640xf32>
    %c0_6 = arith.constant 0 : index
    %c0_7 = arith.constant 0 : index
    %8 = vector.load %arg3[%c0_6, %c0_7] : memref<640x640xf32, #tpu.memory_space<vmem>>, vector<640x640xf32>
    %cst_8 = arith.constant dense<0.000000e+00> : vector<16x640xf32>
    %9 = tpu.matmul %7, %8, %cst_8 {dimension_numbers = #tpu.dot_dimension_numbers<[1], [0], [0], [1], [0, 0, 1, 1], [], []>} : vector<16x640xf32>, vector<640x640xf32>, vector<16x640xf32> -> vector<16x640xf32>
    %c1 = arith.constant 1 : index
    %c0_9 = arith.constant 0 : index
    %10 = vector.load %arg5[%c1, %c0_9] : memref<8x640xf32, #tpu.memory_space<vmem>>, vector<1x640xf32>
    %11 = vector.broadcast %10 : vector<1x640xf32> to vector<16x640xf32>
    %12 = arith.addf %9, %11 : vector<16x640xf32>
    %cst_10 = arith.constant 0.000000e+00 : f32
    %13 = vector.broadcast %cst_10 : f32 to vector<16x640xf32>
    %14 = arith.maximumf %12, %13 : vector<16x640xf32>
    %c0_11 = arith.constant 0 : index
    %c0_12 = arith.constant 0 : index
    %15 = vector.load %arg4[%c0_11, %c0_12] : memref<640x128xf32, #tpu.memory_space<vmem>>, vector<640x128xf32>
    %cst_13 = arith.constant dense<0.000000e+00> : vector<16x128xf32>
    %16 = tpu.matmul %14, %15, %cst_13 {dimension_numbers = #tpu.dot_dimension_numbers<[1], [0], [0], [1], [0, 0, 1, 1], [], []>} : vector<16x640xf32>, vector<640x128xf32>, vector<16x128xf32> -> vector<16x128xf32>
    %c2 = arith.constant 2 : index
    %c0_14 = arith.constant 0 : index
    %17 = vector.load %arg5[%c2, %c0_14] : memref<8x640xf32, #tpu.memory_space<vmem>>, vector<1x128xf32>
    %18 = vector.broadcast %17 : vector<1x128xf32> to vector<16x128xf32>
    %19 = arith.addf %16, %18 : vector<16x128xf32>
    %c0_15 = arith.constant 0 : index
    %c0_16 = arith.constant 0 : index
    %20 = vector.load %arg6[%c0_15, %c0_16] : memref<16x128xf32, #tpu.memory_space<vmem>>, vector<16x128xf32>
    tpu.vector_store %arg6[%c0_15, %c0_16], %19 {strides = array<i32>} : memref<16x128xf32, #tpu.memory_space<vmem>>, vector<16x128xf32>,
    return
  }
  func.func @transform_0(%arg0: i32) -> (i32, i32) {
    %c0_i32 = arith.constant 0 : i32
    %c0_i32_0 = arith.constant 0 : i32
    return %arg0, %c0_i32 : i32, i32
  }
  func.func @transform_1(%arg0: i32) -> (i32, i32) {
    %c0_i32 = arith.constant 0 : i32
    %c0_i32_0 = arith.constant 0 : i32
    %c0_i32_1 = arith.constant 0 : i32
    return %c0_i32, %c0_i32_0 : i32, i32
  }
  func.func @transform_2(%arg0: i32) -> (i32, i32) {
    %c0_i32 = arith.constant 0 : i32
    %c0_i32_0 = arith.constant 0 : i32
    %c0_i32_1 = arith.constant 0 : i32
    return %c0_i32, %c0_i32_0 : i32, i32
  }
  func.func @transform_3(%arg0: i32) -> (i32, i32) {
    %c0_i32 = arith.constant 0 : i32
    %c0_i32_0 = arith.constant 0 : i32
    %c0_i32_1 = arith.constant 0 : i32
    return %c0_i32, %c0_i32_0 : i32, i32
  }
  func.func @transform_4(%arg0: i32) -> (i32, i32) {
    %c0_i32 = arith.constant 0 : i32
    %c0_i32_0 = arith.constant 0 : i32
    %c0_i32_1 = arith.constant 0 : i32
    return %c0_i32, %c0_i32_0 : i32, i32
  }
  func.func @transform_5(%arg0: i32) -> (i32, i32) {
    %c0_i32 = arith.constant 0 : i32
    %c0_i32_0 = arith.constant 0 : i32
    return %arg0, %c0_i32 : i32, i32
  }
}

</mosaic_0001>

<bundles_post_ra>
// kernel: tpu_custom_call.1
= control target key start
LH: loop header
LB: loop body
LE: loop exit
PB: predicated region body
PF: predicated region fallthrough
CT: control target
= control target key end

     0   :  { %10 = vsyncpa [#allocation3], 0  ;;  %s3379_s0 = inlined_call_operand.hbm [shape: f32[16,256], index: 0, kind: input, shape index: {}]   ;;  %s3380_s1 = inlined_call_operand.hbm [shape: f32[256,640], index: 1, kind: input, shape index: {}]   ;;  %s3381_s2 = inlined_call_operand.hbm [shape: f32[640,640], index: 2, kind: input, shape index: {}]   ;;  %s3382_s3 = inlined_call_operand.hbm [shape: f32[640,128], index: 3, kind: input, shape index: {}]   ;;  %s3383_s4 = inlined_call_operand.hbm [shape: f32[8,640], index: 4, kind: input, shape index: {}]   ;;  %s3384_s5 = inlined_call_operand.hbm [shape: f32[16,128], index: 5, kind: output, shape index: {}]  }
   0x1   :  { %11 = vsyncpa [#allocation6], 0 }
   0x2   :  { %12 = vsyncpa [#allocation9], 0 }
   0x3   :  { %13 = vsyncpa [#allocation4], 0  ;;  %s3118_s18 = smov [#allocation5]   ;;  %s2978_s22 = scalar_lea.hbm %s3380_s1, 20480 }
   0x4   :  { %s31_s19 = sshll.u32 %s3118_s18, 4  ;;  %p2979_p0 = scmp.ne.s32.totalorder %s3380_s1, %s2978_s22  ;;  %s32_s19 = int_to_ptr.vmem [resolvable:$true] %s31_s19 }
   0x5   :  { %p2982_p1 = scmp.lt.u32.totalorder %s2978_s22, %s3380_s1 }
   0x7   :  { %p2984_p2 = pnand %p2982_p1, %p2979_p0 }
   0x9   :  { %2987 = shalt.err (!%p2984_p2)
}
   0xa   :  { %s2988_s27 = scalar_lea.vmem %s32_s19, 20480  ;;  %p2993_p4 = scmp.lt.s32.totalorder %s32_s19, %s32_s19 }
   0xb   :  { %p2989_p3 = scmp.ne.s32.totalorder %s32_s19, %s2988_s27  ;;  %p2994_p5 = scmp.lt.s32.totalorder %s2988_s27, %s2988_s27 }
   0xd   :  { %p2995_p6 = por %p2994_p5, %p2993_p4 }
   0xf   :  { %p2996_p7 = pnand %p2995_p6, %p2989_p3 }
  0x11   :  { %2999 = shalt.err (!%p2996_p7)
}
  0x12   :  { %s3119_s28 = smov 640   ;;  %s3120_s29 = smov 40  }
  0x13   :  { %37 = dma.hbm_to_vmem [thread:$0]  %s3380_s1, 20480, %s32_s19, [#allocation6], %s3119_s28, %s3119_s28, %s3120_s29  }
  0x14   :  { %s3121_s7 = smov [#allocation8]   ;;  %s3000_s11 = scalar_lea.hbm %s3382_s3, 10240 }
  0x15   :  { %s55_s8 = sshll.u32 %s3121_s7, 4  ;;  %p3001_p8 = scmp.ne.s32.totalorder %s3382_s3, %s3000_s11  ;;  %s56_s8 = int_to_ptr.vmem [resolvable:$true] %s55_s8 }
  0x16   :  { %p3004_p9 = scmp.lt.u32.totalorder %s3000_s11, %s3382_s3 }
  0x18   :  { %p3006_p10 = pnand %p3004_p9, %p3001_p8 }
  0x1a   :  { %3009 = shalt.err (!%p3006_p10)
}
  0x1b   :  { %s3010_s16 = scalar_lea.vmem %s56_s8, 10240  ;;  %p3015_p12 = scmp.lt.s32.totalorder %s56_s8, %s56_s8 }
  0x1c   :  { %p3011_p11 = scmp.ne.s32.totalorder %s56_s8, %s3010_s16  ;;  %p3016_p13 = scmp.lt.s32.totalorder %s3010_s16, %s3010_s16 }
  0x1e   :  { %p3017_p0 = por %p3016_p13, %p3015_p12 }
  0x20   :  { %p3018_p1 = pnand %p3017_p0, %p3011_p11 }
  0x22   :  { %3021 = shalt.err (!%p3018_p1)
}
  0x23   :  { %s3122_s1 = smov 128   ;;  %s3123_s17 = smov 8  }
  0x24   :  { %61 = dma.hbm_to_vmem [thread:$0]  %s3382_s3, 10240, %s56_s8, [#allocation9], %s3122_s1, %s3122_s1, %s3123_s17  }
  0x25   :  { %s3124_s20 = smov [#allocation2]   ;;  %s3022_s24 = scalar_lea.hbm %s3379_s0, 512 }
  0x26   :  { %s19_s21 = sshll.u32 %s3124_s20, 4  ;;  %p3023_p2 = scmp.ne.s32.totalorder %s3379_s0, %s3022_s24  ;;  %s20_s21 = int_to_ptr.vmem [resolvable:$true] %s19_s21 }
  0x27   :  { %p3026_p3 = scmp.lt.u32.totalorder %s3022_s24, %s3379_s0 }
  0x29   :  { %p3028_p4 = pnand %p3026_p3, %p3023_p2 }
  0x2b   :  { %3031 = shalt.err (!%p3028_p4)
}
  0x2c   :  { %s3032_s6 = scalar_lea.vmem %s20_s21, 512  ;;  %p3037_p6 = scmp.lt.s32.totalorder %s20_s21, %s20_s21 }
  0x2d   :  { %p3033_p5 = scmp.ne.s32.totalorder %s20_s21, %s3032_s6  ;;  %p3038_p7 = scmp.lt.s32.totalorder %s3032_s6, %s3032_s6 }
  0x2f   :  { %p3039_p8 = por %p3038_p7, %p3037_p6 }
  0x31   :  { %p3040_p9 = pnand %p3039_p8, %p3033_p5 }
  0x33   :  { %3043 = shalt.err (!%p3040_p9)
}
  0x34   :  { %s3125_s3 = smov 256   ;;  %s3126_s7 = smov 16  }
  0x35   :  { %25 = dma.hbm_to_vmem [thread:$0]  %s3379_s0, 512, %s20_s21, [#allocation3], %s3125_s3, %s3125_s3, %s3126_s7  }
  0x36   :  { %s3127_s10 = smov [#allocation7]   ;;  %s3128_s12 = smov [#allocation10]  }
  0x37   :  { %s43_s11 = sshll.u32 %s3127_s10, 4  ;;  %s68_s13 = sshll.u32 %s3128_s12, 4  ;;  %s44_s11 = int_to_ptr.vmem [resolvable:$true] %s43_s11  ;;  %s69_s13 = int_to_ptr.vmem [resolvable:$true] %s68_s13 }
  0x38   :  { %s3044_s16 = scalar_lea.hbm %s3381_s2, 51200 }
  0x39   :  { %p3045_p10 = scmp.ne.s32.totalorder %s3381_s2, %s3044_s16  ;;  %p3048_p11 = scmp.lt.u32.totalorder %s3044_s16, %s3381_s2 }
  0x3b   :  { %p3050_p12 = pnand %p3048_p11, %p3045_p10 }
  0x3d   :  { %3053 = shalt.err (!%p3050_p12)
}
  0x3e   :  { %s3054_s0 = scalar_lea.vmem %s44_s11, 51200  ;;  %p3059_p0 = scmp.lt.s32.totalorder %s44_s11, %s44_s11 }
  0x3f   :  { %p3055_p13 = scmp.ne.s32.totalorder %s44_s11, %s3054_s0  ;;  %p3060_p1 = scmp.lt.s32.totalorder %s3054_s0, %s3054_s0 }
  0x41   :  { %p3061_p2 = por %p3060_p1, %p3059_p0 }
  0x43   :  { %p3062_p3 = pnand %p3061_p2, %p3055_p13 }
  0x45   :  { %3065 = shalt.err (!%p3062_p3)
}
  0x46   :  { %49 = dma.hbm_to_vmem [thread:$0]  %s3381_s2, 51200, %s44_s11, [#allocation6], %s3119_s28, %s3119_s28, %s3120_s29  }
  0x47   :  { %s3066_s26 = scalar_lea.hbm %s3383_s4, 640 }
  0x48   :  { %p3067_p4 = scmp.ne.s32.totalorder %s3383_s4, %s3066_s26  ;;  %p3070_p5 = scmp.lt.u32.totalorder %s3066_s26, %s3383_s4 }
  0x4a   :  { %p3072_p6 = pnand %p3070_p5, %p3067_p4 }
  0x4c   :  { %3075 = shalt.err (!%p3072_p6)
}
  0x4d   :  { %s3076_s7 = scalar_lea.vmem %s69_s13, 640  ;;  %p3081_p8 = scmp.lt.s32.totalorder %s69_s13, %s69_s13 }
  0x4e   :  { %p3077_p7 = scmp.ne.s32.totalorder %s69_s13, %s3076_s7  ;;  %p3082_p9 = scmp.lt.s32.totalorder %s3076_s7, %s3076_s7 }
  0x50   :  { %p3083_p10 = por %p3082_p9, %p3081_p8 }
  0x52   :  { %p3084_p11 = pnand %p3083_p10, %p3077_p7 }
  0x54   :  { %3087 = shalt.err (!%p3084_p11)
}
  0x55   :  { %71 = dma.hbm_to_vmem [thread:$0]  %s3383_s4, 640, %s69_s13, [#allocation9]  }
  0x56   :  { %3110 = dma.done.wait [#allocation3], 512  }
  0x57   :  { %3111 = vsyncadd [#allocation3], 4294966784 }
  0x58   :  { %3112 = dma.done.wait [#allocation6], 71680  }
  0x59   :  { %3113 = vsyncadd [#allocation6], 4294895616 }
  0x5a   :  { %3114 = dma.done.wait [#allocation9], 10880  }
  0x5b   :  { %3115 = vsyncadd [#allocation9], 4294956416  ;;  %v92_v0 = vld [vmem:[#allocation5 + $0x8] sm:$0xff]  ;;  %v97_v1 = vld [vmem:[#allocation5 + $0x30] sm:$0xff]  ;;  %s3130_s4 = smov [#allocation11]  }
  0x5c   :  { %v91_v2 = vld [vmem:[#allocation5] sm:$0xff]  ;;  %v2269_v3 = vpack.c.bf16 %v97_v1, %v92_v0  ;;  %v96_v4 = vld [vmem:[#allocation5 + $0x28] sm:$0xff]  ;;  %v102_v5 = vld [vmem:[#allocation5 + $0x58] sm:$0xff]  ;;  %s1959_s29 = sshll.u32 %s3130_s4, 4  ;;  %s1960_s29 = int_to_ptr.vmem [resolvable:$true] %s1959_s29 }
  0x5d   :  { %v107_v6 = vld [vmem:[#allocation5 + $0x80] sm:$0xff]  ;;  %v2271_v7 = vpack.c.bf16 %v96_v4, %v91_v2  ;;  %v101_v9 = vld [vmem:[#allocation5 + $0x50] sm:$0xff]  ;;  %v106_v10 = vld [vmem:[#allocation5 + $0x78] sm:$0xff]  ;;  %s3088_s8 = scalar_lea.vmem %s1960_s29, 256  ;;  %p3093_p13 = scmp.lt.s32.totalorder %s1960_s29, %s1960_s29 }
  0x5e   :  { %v2273_v8 = vpack.c.bf16 %v107_v6, %v102_v5  ;;  %v112_v11 = vld [vmem:[#allocation5 + $0xa8] sm:$0xff]  ;;  %2270 = vmatprep.subr.bf16.mxu0 %v2269_v3  ;;  %v117_v12 = vld [vmem:[#allocation5 + $0xd0] sm:$0xff]  ;;  %v2275_v13 = vpack.c.bf16 %v106_v10, %v101_v9  ;;  %v111_v15 = vld [vmem:[#allocation5 + $0xa0] sm:$0xff]  ;;  %p3089_p12 = scmp.ne.s32.totalorder %s1960_s29, %s3088_s8  ;;  %p3094_p0 = scmp.lt.s32.totalorder %s3088_s8, %s3088_s8 }
  0x5f   :  { %2272 = vmatpush1.bf16.msra.mxu0 %v2271_v7  ;;  %v2277_v14 = vpack.c.bf16 %v117_v12, %v112_v11  ;;  %v116_v16 = vld [vmem:[#allocation5 + $0xc8] sm:$0xff]  ;;  %v122_v17 = vld [vmem:[#allocation5 + $0xf8] sm:$0xff]  ;;  %v127_v18 = vld [vmem:[#allocation5 + $0x120] sm:$0xff] }
  0x60   :  { %2274 = vmatprep.subr.bf16.mxu0 %v2273_v8  ;;  %v2279_v19 = vpack.c.bf16 %v116_v16, %v111_v15  ;;  %v2281_v20 = vpack.c.bf16 %v127_v18, %v122_v17  ;;  %v121_v21 = vld [vmem:[#allocation5 + $0xf0] sm:$0xff]  ;;  %v126_v22 = vld [vmem:[#allocation5 + $0x118] sm:$0xff]  ;;  %v132_v23 = vld [vmem:[#allocation5 + $0x148] sm:$0xff]  ;;  %p3095_p1 = por %p3094_p0, %p3093_p13 }
  0x61   :  { %v137_v24 = vld [vmem:[#allocation5 + $0x170] sm:$0xff]  ;;  %v2283_v25 = vpack.c.bf16 %v126_v22, %v121_v21  ;;  %v131_v27 = vld [vmem:[#allocation5 + $0x140] sm:$0xff]  ;;  %v136_v28 = vld [vmem:[#allocation5 + $0x168] sm:$0xff] }
  0x62   :  { %v2285_v26 = vpack.c.bf16 %v137_v24, %v132_v23  ;;  %v142_v29 = vld [vmem:[#allocation5 + $0x198] sm:$0xff]  ;;  %v147_v30 = vld [vmem:[#allocation5 + $0x1c0] sm:$0xff]  ;;  %v2287_v31 = vpack.c.bf16 %v136_v28, %v131_v27  ;;  %v141_v33 = vld [vmem:[#allocation5 + $0x190] sm:$0xff]  ;;  %p3096_p2 = pnand %p3095_p1, %p3089_p12 }
  0x63   :  { %2276 = vmatpush1.bf16.msra.mxu0 %v2275_v13  ;;  %v2289_v32 = vpack.c.bf16 %v147_v30, %v142_v29  ;;  %v146_v34 = vld [vmem:[#allocation5 + $0x1b8] sm:$0xff]  ;;  %v152_v35 = vld [vmem:[#allocation5 + $0x1e8] sm:$0xff]  ;;  %v157_v36 = vld [vmem:[#allocation5 + $0x210] sm:$0xff] }
  0x64   :  { %2278 = vmatprep.subr.bf16.mxu0 %v2277_v14  ;;  %v2291_v37 = vpack.c.bf16 %v146_v34, %v141_v33  ;;  %v151_v38 = vld [vmem:[#allocation5 + $0x1e0] sm:$0xff]  ;;  %v156_v39 = vld [vmem:[#allocation5 + $0x208] sm:$0xff]  ;;  %v2293_v40 = vpack.c.bf16 %v157_v36, %v152_v35  ;;  %v162_v41 = vld [vmem:[#allocation5 + $0x238] sm:$0xff] }
  0x65   :  { %v3230_v42 = vld [vmem:[#allocation2 + $0x8] sm:$0xff]  ;;  %v94_v43 = vld [vmem:[#allocation5 + $0x18] sm:$0xff]  ;;  %v167_v44 = vld [vmem:[#allocation5 + $0x260] sm:$0xff]  ;;  %v2295_v51 = vpack.c.bf16 %v156_v39, %v151_v38 }
  0x66   :  { %344 = vmatprep.mubr.f32.mxu0 %v3230_v42  ;;  %v99_v45 = vld [vmem:[#allocation5 + $0x40] sm:$0xff]  ;;  %v93_v46 = vld [vmem:[#allocation5 + $0x10] sm:$0xff]  ;;  %421 = vmatprep.mubr.f32.mxu1 %v3230_v42  ;;  %v98_v48 = vld [vmem:[#allocation5 + $0x38] sm:$0xff]  ;;  %v2297_v57 = vpack.c.bf16 %v167_v44, %v162_v41 }
  0x67   :  { %2280 = vmatpush1.bf16.msra.mxu0 %v2279_v19  ;;  %v2333_v47 = vpack.c.bf16 %v99_v45, %v94_v43  ;;  %v104_v49 = vld [vmem:[#allocation5 + $0x68] sm:$0xff]  ;;  %v109_v50 = vld [vmem:[#allocation5 + $0x90] sm:$0xff]  ;;  %v2335_v52 = vpack.c.bf16 %v98_v48, %v93_v46  ;;  %v103_v54 = vld [vmem:[#allocation5 + $0x60] sm:$0xff] }
  0x68   :  { %2282 = vmatprep.subr.bf16.mxu0 %v2281_v20  ;;  %v2337_v53 = vpack.c.bf16 %v109_v50, %v104_v49  ;;  %v108_v55 = vld [vmem:[#allocation5 + $0x88] sm:$0xff]  ;;  %v114_v56 = vld [vmem:[#allocation5 + $0xb8] sm:$0xff]  ;;  %v161_v58 = vld [vmem:[#allocation5 + $0x230] sm:$0xff] }
  0x69   :  { %v166_v59 = vld [vmem:[#allocation5 + $0x258] sm:$0xff]  ;;  %2334 = vmatprep.subr.bf16.mxu1 %v2333_v47  ;;  %v119_v60 = vld [vmem:[#allocation5 + $0xe0] sm:$0xff]  ;;  %v172_v61 = vld [vmem:[#allocation5 + $0x288] sm:$0xff]  ;;  %v2339_v63 = vpack.c.bf16 %v108_v55, %v103_v54 }
  0x6a   :  { %v177_v62 = vld [vmem:[#allocation5 + $0x2b0] sm:$0xff]  ;;  %2336 = vmatpush1.bf16.msra.mxu1 %v2335_v52  ;;  %v2341_v0 = vpack.c.bf16 %v119_v60, %v114_v56  ;;  %v118_v2 = vld [vmem:[#allocation5 + $0xd8] sm:$0xff]  ;;  %v2299_v3 = vpack.c.bf16 %v166_v59, %v161_v58  ;;  %v124_v4 = vld [vmem:[#allocation5 + $0x108] sm:$0xff] }
  0x6b   :  { %2284 = vmatpush1.bf16.msra.mxu0 %v2283_v25  ;;  %2338 = vmatprep.subr.bf16.mxu1 %v2337_v53  ;;  %v113_v1 = vld [vmem:[#allocation5 + $0xb0] sm:$0xff]  ;;  %v2301_v6 = vpack.c.bf16 %v177_v62, %v172_v61  ;;  %v171_v7 = vld [vmem:[#allocation5 + $0x280] sm:$0xff]  ;;  %v176_v8 = vld [vmem:[#allocation5 + $0x2a8] sm:$0xff] }
  0x6c   :  { %2286 = vmatprep.subr.bf16.mxu0 %v2285_v26  ;;  %v129_v5 = vld [vmem:[#allocation5 + $0x130] sm:$0xff]  ;;  %v182_v9 = vld [vmem:[#allocation5 + $0x2d8] sm:$0xff]  ;;  %v187_v10 = vld [vmem:[#allocation5 + $0x300] sm:$0xff]  ;;  %v2343_v11 = vpack.c.bf16 %v118_v2, %v113_v1  ;;  %v2303_v15 = vpack.c.bf16 %v176_v8, %v171_v7 }
  0x6d   :  { %v2345_v12 = vpack.c.bf16 %v129_v5, %v124_v4  ;;  %v123_v13 = vld [vmem:[#allocation5 + $0x100] sm:$0xff]  ;;  %v128_v14 = vld [vmem:[#allocation5 + $0x128] sm:$0xff]  ;;  %v134_v16 = vld [vmem:[#allocation5 + $0x158] sm:$0xff]  ;;  %v2305_v18 = vpack.c.bf16 %v187_v10, %v182_v9 }
  0x6e   :  { %2340 = vmatpush1.bf16.msra.mxu1 %v2339_v63  ;;  %v139_v17 = vld [vmem:[#allocation5 + $0x180] sm:$0xff]  ;;  %v181_v19 = vld [vmem:[#allocation5 + $0x2d0] sm:$0xff]  ;;  %v186_v20 = vld [vmem:[#allocation5 + $0x2f8] sm:$0xff]  ;;  %v2347_v23 = vpack.c.bf16 %v128_v14, %v123_v13 }
  0x6f   :  { %2288 = vmatpush1.bf16.msra.mxu0 %v2287_v31  ;;  %2342 = vmatprep.subr.bf16.mxu1 %v2341_v0  ;;  %v192_v21 = vld [vmem:[#allocation5 + $0x328] sm:$0xff]  ;;  %v197_v22 = vld [vmem:[#allocation5 + $0x350] sm:$0xff]  ;;  %v2349_v24 = vpack.c.bf16 %v139_v17, %v134_v16  ;;  %v138_v26 = vld [vmem:[#allocation5 + $0x178] sm:$0xff]  ;;  %v2307_v27 = vpack.c.bf16 %v186_v20, %v181_v19 }
  0x70   :  { %2290 = vmatprep.subr.bf16.mxu0 %v2289_v32  ;;  %v133_v25 = vld [vmem:[#allocation5 + $0x150] sm:$0xff]  ;;  %v144_v28 = vld [vmem:[#allocation5 + $0x1a8] sm:$0xff]  ;;  %v2309_v30 = vpack.c.bf16 %v197_v22, %v192_v21  ;;  %v191_v31 = vld [vmem:[#allocation5 + $0x320] sm:$0xff] }
  0x71   :  { %v149_v29 = vld [vmem:[#allocation5 + $0x1d0] sm:$0xff]  ;;  %v196_v32 = vld [vmem:[#allocation5 + $0x348] sm:$0xff]  ;;  %v202_v33 = vld [vmem:[#allocation5 + $0x378] sm:$0xff]  ;;  %v2351_v35 = vpack.c.bf16 %v138_v26, %v133_v25 }
  0x72   :  { %2344 = vmatpush1.bf16.msra.mxu1 %v2343_v11  ;;  %v207_v34 = vld [vmem:[#allocation5 + $0x3a0] sm:$0xff]  ;;  %v2353_v36 = vpack.c.bf16 %v149_v29, %v144_v28  ;;  %v148_v38 = vld [vmem:[#allocation5 + $0x1c8] sm:$0xff]  ;;  %v2311_v39 = vpack.c.bf16 %v196_v32, %v191_v31  ;;  %v201_v44 = vld [vmem:[#allocation5 + $0x370] sm:$0xff] }
  0x73   :  { %2292 = vmatpush1.bf16.msra.mxu0 %v2291_v37  ;;  %2346 = vmatprep.subr.bf16.mxu1 %v2345_v12  ;;  %v143_v37 = vld [vmem:[#allocation5 + $0x1a0] sm:$0xff]  ;;  %v2313_v43 = vpack.c.bf16 %v207_v34, %v202_v33  ;;  %v206_v45 = vld [vmem:[#allocation5 + $0x398] sm:$0xff]  ;;  %v212_v46 = vld [vmem:[#allocation5 + $0x3c8] sm:$0xff] }
  0x74   :  { %2294 = vmatprep.subr.bf16.mxu0 %v2293_v40  ;;  %v154_v40 = vld [vmem:[#allocation5 + $0x1f8] sm:$0xff]  ;;  %v159_v41 = vld [vmem:[#allocation5 + $0x220] sm:$0xff]  ;;  %v217_v47 = vld [vmem:[#allocation5 + $0x3f0] sm:$0xff]  ;;  %v2355_v48 = vpack.c.bf16 %v148_v38, %v143_v37  ;;  %v2315_v52 = vpack.c.bf16 %v206_v45, %v201_v44 }
  0x75   :  { %v2357_v49 = vpack.c.bf16 %v159_v41, %v154_v40  ;;  %v153_v50 = vld [vmem:[#allocation5 + $0x1f0] sm:$0xff]  ;;  %v164_v53 = vld [vmem:[#allocation5 + $0x248] sm:$0xff]  ;;  %v2317_v55 = vpack.c.bf16 %v217_v47, %v212_v46  ;;  %v211_v56 = vld [vmem:[#allocation5 + $0x3c0] sm:$0xff] }
  0x76   :  { %2348 = vmatpush1.bf16.msra.mxu1 %v2347_v23  ;;  %v169_v54 = vld [vmem:[#allocation5 + $0x270] sm:$0xff]  ;;  %v222_v58 = vld [vmem:[#allocation5 + $0x418] sm:$0xff]  ;;  %v227_v59 = vld [vmem:[#allocation5 + $0x440] sm:$0xff] }
  0x77   :  { %2296 = vmatpush1.bf16.msra.mxu0 %v2295_v51  ;;  %2350 = vmatprep.subr.bf16.mxu1 %v2349_v24  ;;  %v158_v51 = vld [vmem:[#allocation5 + $0x218] sm:$0xff]  ;;  %v2361_v61 = vpack.c.bf16 %v169_v54, %v164_v53  ;;  %v163_v62 = vld [vmem:[#allocation5 + $0x240] sm:$0xff]  ;;  %v168_v63 = vld [vmem:[#allocation5 + $0x268] sm:$0xff] }
  0x78   :  { %2298 = vmatprep.subr.bf16.mxu0 %v2297_v57  ;;  %v216_v57 = vld [vmem:[#allocation5 + $0x3e8] sm:$0xff]  ;;  %v2359_v60 = vpack.c.bf16 %v158_v51, %v153_v50  ;;  %v174_v1 = vld [vmem:[#allocation5 + $0x298] sm:$0xff]  ;;  %v179_v2 = vld [vmem:[#allocation5 + $0x2c0] sm:$0xff]  ;;  %v2363_v8 = vpack.c.bf16 %v168_v63, %v163_v62 }
  0x79   :  { %v2319_v0 = vpack.c.bf16 %v216_v57, %v211_v56  ;;  %v221_v4 = vld [vmem:[#allocation5 + $0x410] sm:$0xff]  ;;  %v226_v5 = vld [vmem:[#allocation5 + $0x438] sm:$0xff]  ;;  %v2365_v9 = vpack.c.bf16 %v179_v2, %v174_v1  ;;  %v184_v13 = vld [vmem:[#allocation5 + $0x2e8] sm:$0xff] }
  0x7a   :  { %2352 = vmatpush1.bf16.msra.mxu1 %v2351_v35  ;;  %v237_v7 = vld [vmem:[#allocation5 + $0x490] sm:$0xff]  ;;  %v178_v11 = vld [vmem:[#allocation5 + $0x2b8] sm:$0xff]  ;;  %v2323_v12 = vpack.c.bf16 %v226_v5, %v221_v4  ;;  %v231_v16 = vld [vmem:[#allocation5 + $0x460] sm:$0xff] }
  0x7b   :  { %2300 = vmatpush1.bf16.msra.mxu0 %v2299_v3  ;;  %2354 = vmatprep.subr.bf16.mxu1 %v2353_v36  ;;  %v2321_v3 = vpack.c.bf16 %v227_v59, %v222_v58  ;;  %v173_v10 = vld [vmem:[#allocation5 + $0x290] sm:$0xff]  ;;  %v236_v17 = vld [vmem:[#allocation5 + $0x488] sm:$0xff]  ;;  %v247_v19 = vld [vmem:[#allocation5 + $0x4e0] sm:$0xff] }
  0x7c   :  { %2302 = vmatprep.subr.bf16.mxu0 %v2301_v6  ;;  %v232_v6 = vld [vmem:[#allocation5 + $0x468] sm:$0xff]  ;;  %v189_v14 = vld [vmem:[#allocation5 + $0x310] sm:$0xff]  ;;  %v2367_v20 = vpack.c.bf16 %v178_v11, %v173_v10  ;;  %v183_v22 = vld [vmem:[#allocation5 + $0x2e0] sm:$0xff]  ;;  %v2327_v24 = vpack.c.bf16 %v236_v17, %v231_v16 }
  0x7d   :  { %v2369_v21 = vpack.c.bf16 %v189_v14, %v184_v13  ;;  %v188_v23 = vld [vmem:[#allocation5 + $0x308] sm:$0xff]  ;;  %v194_v25 = vld [vmem:[#allocation5 + $0x338] sm:$0xff]  ;;  %v199_v26 = vld [vmem:[#allocation5 + $0x360] sm:$0xff] }
  0x7e   :  { %2356 = vmatpush1.bf16.msra.mxu1 %v2355_v48  ;;  %v241_v28 = vld [vmem:[#allocation5 + $0x4b0] sm:$0xff]  ;;  %v246_v29 = vld [vmem:[#allocation5 + $0x4d8] sm:$0xff]  ;;  %v175_v31 = vld [vmem:[#allocation5 + $0x2a0] sm:$0xff]  ;;  %v2373_v33 = vpack.c.bf16 %v199_v26, %v194_v25 }
  0x7f   :  { %2304 = vmatpush1.bf16.msra.mxu0 %v2303_v15  ;;  %2358 = vmatprep.subr.bf16.mxu1 %v2357_v49  ;;  %v2325_v15 = vpack.c.bf16 %v237_v7, %v232_v6  ;;  %v180_v32 = vld [vmem:[#allocation5 + $0x2c8] sm:$0xff]  ;;  %v193_v34 = vld [vmem:[#allocation5 + $0x330] sm:$0xff]  ;;  %v198_v35 = vld [vmem:[#allocation5 + $0x358] sm:$0xff]  ;;  %v2331_v36 = vpack.c.bf16 %v246_v29, %v241_v28 }
  0x80   :  { %2306 = vmatprep.subr.bf16.mxu0 %v2305_v18  ;;  %v242_v18 = vld [vmem:[#allocation5 + $0x4b8] sm:$0xff]  ;;  %v204_v37 = vld [vmem:[#allocation5 + $0x388] sm:$0xff]  ;;  %v209_v38 = vld [vmem:[#allocation5 + $0x3b0] sm:$0xff] }
  0x81   :  { %v95_v40 = vld [vmem:[#allocation5 + $0x20] sm:$0xff]  ;;  %v100_v41 = vld [vmem:[#allocation5 + $0x48] sm:$0xff]  ;;  %v185_v44 = vld [vmem:[#allocation5 + $0x2f0] sm:$0xff]  ;;  %v2377_v46 = vpack.c.bf16 %v209_v38, %v204_v37 }
  0x82   :  { %2360 = vmatpush1.bf16.msra.mxu1 %v2359_v60  ;;  %v190_v45 = vld [vmem:[#allocation5 + $0x318] sm:$0xff]  ;;  %v203_v47 = vld [vmem:[#allocation5 + $0x380] sm:$0xff]  ;;  %v208_v48 = vld [vmem:[#allocation5 + $0x3a8] sm:$0xff] }
  0x83   :  { %2308 = vmatpush1.bf16.msra.mxu0 %v2307_v27  ;;  %2362 = vmatprep.subr.bf16.mxu1 %v2361_v61  ;;  %v2329_v27 = vpack.c.bf16 %v247_v19, %v242_v18  ;;  %v3234_v49 = vld [vmem:[#allocation2] sm:$0xff]  ;;  %v214_v50 = vld [vmem:[#allocation5 + $0x3d8] sm:$0xff]  ;;  %v2401_v54 = vpack.c.bf16 %v190_v45, %v185_v44  ;;  %v2379_v57 = vpack.c.bf16 %v208_v48, %v203_v47  ;;  %v200_v59 = vld [vmem:[#allocation5 + $0x368] sm:$0xff] }
  0x84   :  { %2310 = vmatprep.subr.bf16.mxu0 %v2309_v30  ;;  %v2371_v30 = vpack.c.bf16 %v188_v23, %v183_v22  ;;  %v219_v51 = vld [vmem:[#allocation5 + $0x400] sm:$0xff]  ;;  %v3236_v53 = vld [vmem:[#allocation2 + $0x18] sm:$0xff]  ;;  %v213_v61 = vld [vmem:[#allocation5 + $0x3d0] sm:$0xff] }
  0x85   :  { %v110_v56 = vld [vmem:[#allocation5 + $0x98] sm:$0xff]  ;;  %v195_v58 = vld [vmem:[#allocation5 + $0x340] sm:$0xff]  ;;  %v2381_v60 = vpack.c.bf16 %v219_v51, %v214_v50  ;;  %v224_v63 = vld [vmem:[#allocation5 + $0x428] sm:$0xff] }
  0x86   :  { %2364 = vmatpush1.bf16.msra.mxu1 %v2363_v8  ;;  %v218_v62 = vld [vmem:[#allocation5 + $0x3f8] sm:$0xff]  ;;  %v3240_v1 = vld [vmem:[#allocation2 + $0x10] sm:$0xff]  ;;  %v115_v4 = vld [vmem:[#allocation5 + $0xc0] sm:$0xff] }
  0x87   :  { %2312 = vmatpush1.bf16.msra.mxu0 %v2311_v39  ;;  %2366 = vmatprep.subr.bf16.mxu1 %v2365_v9  ;;  %v2397_v39 = vpack.c.bf16 %v180_v32, %v175_v31  ;;  %v120_v5 = vld [vmem:[#allocation5 + $0xe8] sm:$0xff]  ;;  %v2383_v6 = vpack.c.bf16 %v218_v62, %v213_v61  ;;  %v205_v7 = vld [vmem:[#allocation5 + $0x390] sm:$0xff]  ;;  %v210_v8 = vld [vmem:[#allocation5 + $0x3b8] sm:$0xff] }
  0x88   :  { %2314 = vmatprep.subr.bf16.mxu0 %v2313_v43  ;;  %v2375_v43 = vpack.c.bf16 %v198_v35, %v193_v34  ;;  %v223_v10 = vld [vmem:[#allocation5 + $0x420] sm:$0xff]  ;;  %v228_v11 = vld [vmem:[#allocation5 + $0x448] sm:$0xff]  ;;  %v2407_v14 = vpack.c.bf16 %v120_v5, %v115_v4  ;;  %v125_v16 = vld [vmem:[#allocation5 + $0x110] sm:$0xff] }
  0x89   :  { %v239_v13 = vld [vmem:[#allocation5 + $0x4a0] sm:$0xff]  ;;  %v130_v17 = vld [vmem:[#allocation5 + $0x138] sm:$0xff]  ;;  %v2387_v18 = vpack.c.bf16 %v228_v11, %v223_v10  ;;  %v233_v22 = vld [vmem:[#allocation5 + $0x470] sm:$0xff] }
  0x8a   :  { %2368 = vmatpush1.bf16.msra.mxu1 %v2367_v20  ;;  %v215_v19 = vld [vmem:[#allocation5 + $0x3e0] sm:$0xff]  ;;  %v220_v20 = vld [vmem:[#allocation5 + $0x408] sm:$0xff]  ;;  %v238_v23 = vld [vmem:[#allocation5 + $0x498] sm:$0xff]  ;;  %v2411_v26 = vpack.c.bf16 %v130_v17, %v125_v16 }
  0x8b   :  { %2316 = vmatpush1.bf16.msra.mxu0 %v2315_v52  ;;  %2370 = vmatprep.subr.bf16.mxu1 %v2369_v21  ;;  %v2399_v52 = vpack.c.bf16 %v100_v41, %v95_v40  ;;  %v249_v25 = vld [vmem:[#allocation5 + $0x4f0] sm:$0xff]  ;;  %v135_v28 = vld [vmem:[#allocation5 + $0x160] sm:$0xff]  ;;  %v2391_v29 = vpack.c.bf16 %v238_v23, %v233_v22  ;;  %v230_v31 = vld [vmem:[#allocation5 + $0x458] sm:$0xff] }
  0x8c   :  { %2318 = vmatprep.subr.bf16.mxu0 %v2317_v55  ;;  %v105_v55 = vld [vmem:[#allocation5 + $0x70] sm:$0xff]  ;;  %v248_v34 = vld [vmem:[#allocation5 + $0x4e8] sm:$0xff]  ;;  %v150_v40 = vld [vmem:[#allocation5 + $0x1d8] sm:$0xff] }
  0x8d   :  { %v2403_v2 = vpack.c.bf16 %v110_v56, %v105_v55  ;;  %v525_v37 = vld [vmem:[#allocation7 + $0x30] sm:$0xff]  ;;  %v240_v44 = vld [vmem:[#allocation5 + $0x4a8] sm:$0xff]  ;;  %v530_v50 = vld [vmem:[#allocation7 + $0x58] sm:$0xff] }
  0x8e   :  { %2372 = vmatpush1.bf16.msra.mxu1 %v2371_v30  ;;  %v225_v30 = vld [vmem:[#allocation5 + $0x430] sm:$0xff]  ;;  %v524_v47 = vld [vmem:[#allocation7 + $0x28] sm:$0xff]  ;;  %v535_v51 = vld [vmem:[#allocation7 + $0x80] sm:$0xff] }
  0x8f   :  { %2320 = vmatpush1.bf16.msra.mxu0 %v2319_v0  ;;  %2374 = vmatprep.subr.bf16.mxu1 %v2373_v33  ;;  %v229_v0 = vld [vmem:[#allocation5 + $0x450] sm:$0xff]  ;;  %v243_v33 = vld [vmem:[#allocation5 + $0x4c0] sm:$0xff]  ;;  %v2417_v38 = vpack.c.bf16 %v230_v31, %v225_v30  ;;  %v160_v55 = vld [vmem:[#allocation5 + $0x228] sm:$0xff] }
  0x90   :  { %2322 = vmatprep.subr.bf16.mxu0 %v2321_v3  ;;  %v2405_v3 = vpack.c.bf16 %v200_v59, %v195_v58  ;;  %v2385_v9 = vpack.c.bf16 %v229_v0, %v224_v63  ;;  %v2395_v41 = vpack.c.bf16 %v248_v34, %v243_v33  ;;  %v245_v56 = vld [vmem:[#allocation5 + $0x4d0] sm:$0xff]  ;;  %v2433_v59 = vpack.c.bf16 %v535_v51, %v530_v50  ;;  %v534_v61 = vld [vmem:[#allocation7 + $0x78] sm:$0xff]  ;;  %v540_v63 = vld [vmem:[#allocation7 + $0xa8] sm:$0xff] }
  0x91   :  { %v545_v0 = vld [vmem:[#allocation7 + $0xd0] sm:$0xff]  ;;  %v170_v4 = vld [vmem:[#allocation5 + $0x278] sm:$0xff]  ;;  %v544_v10 = vld [vmem:[#allocation7 + $0xc8] sm:$0xff] }
  0x92   :  { %2376 = vmatpush1.bf16.msra.mxu1 %v2375_v43  ;;  %v235_v43 = vld [vmem:[#allocation5 + $0x480] sm:$0xff]  ;;  %v522_v5 = vld [vmem:[#allocation7 + $0x18] sm:$0xff]  ;;  %v532_v17 = vld [vmem:[#allocation7 + $0x68] sm:$0xff] }
  0x93   :  { %2324 = vmatpush1.bf16.msra.mxu0 %v2323_v12  ;;  %2378 = vmatprep.subr.bf16.mxu1 %v2377_v46  ;;  %v234_v12 = vld [vmem:[#allocation5 + $0x478] sm:$0xff]  ;;  %v519_v46 = vld [vmem:[#allocation7] sm:$0xff]  ;;  %v564_v33 = vld [vmem:[#allocation7 + $0x168] sm:$0xff] }
  0x94   :  { %2326 = vmatprep.subr.bf16.mxu0 %v2325_v15  ;;  %v2409_v15 = vpack.c.bf16 %v210_v8, %v205_v7  ;;  %v2389_v21 = vpack.c.bf16 %v239_v13, %v234_v12  ;;  %v2431_v58 = vpack.c.bf16 %v524_v47, %v519_v46  ;;  %v2437_v8 = vpack.c.bf16 %v545_v0, %v540_v63  ;;  %v550_v12 = vld [vmem:[#allocation7 + $0xf8] sm:$0xff]  ;;  %v555_v13 = vld [vmem:[#allocation7 + $0x120] sm:$0xff]  ;;  %v580_v46 = vld [vmem:[#allocation7 + $0x1e8] sm:$0xff] }
  0x95   :  { %v526_v16 = vld [vmem:[#allocation7 + $0x38] sm:$0xff]  ;;  %v585_v47 = vld [vmem:[#allocation7 + $0x210] sm:$0xff]  ;;  %v551_v50 = vld [vmem:[#allocation7 + $0x100] sm:$0xff] }
  0x96   :  { %2380 = vmatpush1.bf16.msra.mxu1 %v2379_v57  ;;  %v250_v57 = vld [vmem:[#allocation5 + $0x4f8] sm:$0xff]  ;;  %v556_v51 = vld [vmem:[#allocation7 + $0x128] sm:$0xff] }
  0x97   :  { %2328 = vmatpush1.bf16.msra.mxu0 %v2327_v24  ;;  %2382 = vmatprep.subr.bf16.mxu1 %v2381_v60  ;;  %v244_v24 = vld [vmem:[#allocation5 + $0x4c8] sm:$0xff]  ;;  %v529_v60 = vld [vmem:[#allocation7 + $0x50] sm:$0xff]  ;;  %v554_v22 = vld [vmem:[#allocation7 + $0x118] sm:$0xff] }
  0x98   :  { %2330 = vmatprep.subr.bf16.mxu0 %v2329_v27  ;;  %v2413_v27 = vpack.c.bf16 %v220_v20, %v215_v19  ;;  %v2393_v32 = vpack.c.bf16 %v249_v25, %v244_v24  ;;  %v2435_v7 = vpack.c.bf16 %v534_v61, %v529_v60  ;;  %v2441_v20 = vpack.c.bf16 %v555_v13, %v550_v12  ;;  %v560_v24 = vld [vmem:[#allocation7 + $0x148] sm:$0xff]  ;;  %v565_v25 = vld [vmem:[#allocation7 + $0x170] sm:$0xff]  ;;  %v595_v60 = vld [vmem:[#allocation7 + $0x260] sm:$0xff] }
  0x99   :  { %v2445_v31 = vpack.c.bf16 %v565_v25, %v560_v24  ;;  %v566_v63 = vld [vmem:[#allocation7 + $0x178] sm:$0xff]  ;;  %v572_v0 = vld [vmem:[#allocation7 + $0x1a8] sm:$0xff] }
  0x9a   :  { %2384 = vmatpush1.bf16.msra.mxu1 %v2383_v6  ;;  %v527_v6 = vld [vmem:[#allocation7 + $0x40] sm:$0xff]  ;;  %v576_v12 = vld [vmem:[#allocation7 + $0x1c8] sm:$0xff]  ;;  %v582_v13 = vld [vmem:[#allocation7 + $0x1f8] sm:$0xff] }
  0x9b   :  { %2332 = vmatpush1.bf16.msra.mxu0 %v2331_v36  ;;  %2386 = vmatprep.subr.bf16.mxu1 %v2385_v9  ;;  %v520_v36 = vld [vmem:[#allocation7 + $0x8] sm:$0xff]  ;;  %v539_v9 = vld [vmem:[#allocation7 + $0xa0] sm:$0xff]  ;;  %v586_v24 = vld [vmem:[#allocation7 + $0x218] sm:$0xff] }
  0x9c   :  { %2398 = vmatprep.subr.bf16.mxu0 %v2397_v39  ;;  %v145_v39 = vld [vmem:[#allocation5 + $0x1b0] sm:$0xff]  ;;  %v2429_v45 = vpack.c.bf16 %v525_v37, %v520_v36  ;;  %v2439_v19 = vpack.c.bf16 %v544_v10, %v539_v9  ;;  %v575_v36 = vld [vmem:[#allocation7 + $0x1c0] sm:$0xff]  ;;  %v592_v25 = vld [vmem:[#allocation7 + $0x248] sm:$0xff] }
  0x9d   :  { %v2419_v48 = vpack.c.bf16 %v150_v40, %v145_v39  ;;  %v546_v39 = vld [vmem:[#allocation7 + $0xd8] sm:$0xff]  ;;  %v552_v40 = vld [vmem:[#allocation7 + $0x108] sm:$0xff]  ;;  %v605_v9 = vld [vmem:[#allocation7 + $0x2b0] sm:$0xff] }
  0x9e   :  { %345 = vmatmul.mubr.f32.vlgmr.msra.gmra.mrb[0].mxu0 %v3234_v49  ;;  %2388 = vmatpush1.bf16.msra.mxu1 %v2387_v18  ;;  %v537_v18 = vld [vmem:[#allocation7 + $0x90] sm:$0xff] }
  0x9f   :  { %350 = vmatprep.mubr.f32.mxu0 %v3236_v53  ;;  %2400 = vmatpush3.bf16.msra.mxu0 %v2399_v52  ;;  %v2421_v52 = vpack.c.bf16 %v240_v44, %v235_v43  ;;  %v569_v44 = vld [vmem:[#allocation7 + $0x190] sm:$0xff] }
  0xa0   :  { %2402 = vmatprep.subr.bf16.mxu0 %v2401_v54  ;;  %2390 = vmatprep.subr.bf16.mxu1 %v2389_v21  ;;  %v155_v54 = vld [vmem:[#allocation5 + $0x200] sm:$0xff]  ;;  %v549_v21 = vld [vmem:[#allocation7 + $0xf0] sm:$0xff] }
  0xa1   :  { %v2423_v62 = vpack.c.bf16 %v160_v55, %v155_v54  ;;  %v2443_v30 = vpack.c.bf16 %v554_v22, %v549_v21  ;;  %v567_v54 = vld [vmem:[#allocation7 + $0x180] sm:$0xff] }
  0xa2   :  { %351 = vmatmul.mubr.f32.gmra.mrb[2].mxu0 %v3240_v1  ;;  %2392 = vmatpush1.bf16.msra.mxu1 %v2391_v29  ;;  %v547_v29 = vld [vmem:[#allocation7 + $0xe0] sm:$0xff] }
  0xa3   :  { %2404 = vmatpush3.bf16.msra.mxu0 %v2403_v2  ;;  %498 = vmatprep.mubr.f32.mxu0 %v3230_v42  ;;  %v140_v42 = vld [vmem:[#allocation5 + $0x188] sm:$0xff]  ;;  %v2425_v2 = vpack.c.bf16 %v250_v57, %v245_v56  ;;  %v2453_v56 = vpack.c.bf16 %v585_v47, %v580_v46  ;;  %v579_v57 = vld [vmem:[#allocation7 + $0x1e0] sm:$0xff]  ;;  %v606_v46 = vld [vmem:[#allocation7 + $0x2b8] sm:$0xff] }
  0xa4   :  { %2406 = vmatprep.subr.bf16.mxu0 %v2405_v3  ;;  %v2415_v35 = vpack.c.bf16 %v140_v42, %v135_v28  ;;  %2394 = vmatprep.subr.bf16.mxu1 %v2393_v32  ;;  %v165_v3 = vld [vmem:[#allocation5 + $0x250] sm:$0xff]  ;;  %v536_v28 = vld [vmem:[#allocation7 + $0x88] sm:$0xff]  ;;  %v542_v42 = vld [vmem:[#allocation7 + $0xb8] sm:$0xff] }
  0xa5   :  { %v2427_v11 = vpack.c.bf16 %v170_v4, %v165_v3  ;;  %v559_v32 = vld [vmem:[#allocation7 + $0x140] sm:$0xff]  ;;  %v2597_v37 = vpack.c.bf16 %v547_v29, %v542_v42  ;;  %v609_v42 = vld [vmem:[#allocation7 + $0x2d0] sm:$0xff]  ;;  %v614_v29 = vld [vmem:[#allocation7 + $0x2f8] sm:$0xff] }
  0xa6   :  { %2396 = vmatpush1.bf16.msra.mxu1 %v2395_v41  ;;  %v557_v41 = vld [vmem:[#allocation7 + $0x130] sm:$0xff]  ;;  %v2447_v43 = vpack.c.bf16 %v564_v33, %v559_v32  ;;  %v615_v21 = vld [vmem:[#allocation7 + $0x300] sm:$0xff]  ;;  %v612_v47 = vld [vmem:[#allocation7 + $0x2e8] sm:$0xff] }
  0xa7   :  { %2408 = vmatpush3.bf16.msra.mxu0 %v2407_v14  ;;  %2430 = vmatprep.subr.bf16.mxu1 %v2429_v45  ;;  %v2589_v14 = vpack.c.bf16 %v527_v6, %v522_v5  ;;  %v574_v45 = vld [vmem:[#allocation7 + $0x1b8] sm:$0xff]  ;;  %v589_v5 = vld [vmem:[#allocation7 + $0x230] sm:$0xff] }
  0xa8   :  { %2410 = vmatprep.subr.bf16.mxu0 %v2409_v15  ;;  %v521_v15 = vld [vmem:[#allocation7 + $0x10] sm:$0xff]  ;;  %v2451_v55 = vpack.c.bf16 %v574_v45, %v569_v44  ;;  %v594_v6 = vld [vmem:[#allocation7 + $0x258] sm:$0xff]  ;;  %v635_v44 = vld [vmem:[#allocation7 + $0x3a0] sm:$0xff] }
  0xa9   :  { %422 = vmatmul.mubr.f32.vlgmr.msra.gmra.mrb[0].mxu1 %v3234_v49  ;;  %v2591_v23 = vpack.c.bf16 %v526_v16, %v521_v15  ;;  %v2459_v15 = vpack.c.bf16 %v594_v6, %v589_v5  ;;  %v625_v32 = vld [vmem:[#allocation7 + $0x350] sm:$0xff]  ;;  %v655_v5 = vld [vmem:[#allocation7 + $0x440] sm:$0xff] }
  0xaa   :  { %427 = vmatprep.mubr.f32.mxu1 %v3236_v53  ;;  %2432 = vmatpush1.bf16.msra.mxu1 %v2431_v58  ;;  %v2603_v58 = vpack.c.bf16 %v556_v51, %v551_v50 }
  0xab   :  { %2412 = vmatpush3.bf16.msra.mxu0 %v2411_v26  ;;  %2434 = vmatprep.subr.bf16.mxu1 %v2433_v59  ;;  %v2593_v26 = vpack.c.bf16 %v537_v18, %v532_v17  ;;  %v590_v59 = vld [vmem:[#allocation7 + $0x238] sm:$0xff]  ;;  %v599_v17 = vld [vmem:[#allocation7 + $0x280] sm:$0xff]  ;;  %v604_v18 = vld [vmem:[#allocation7 + $0x2a8] sm:$0xff] }
  0xac   :  { %2414 = vmatprep.subr.bf16.mxu0 %v2413_v27  ;;  %v531_v27 = vld [vmem:[#allocation7 + $0x60] sm:$0xff]  ;;  %v2457_v4 = vpack.c.bf16 %v595_v60, %v590_v59  ;;  %v616_v59 = vld [vmem:[#allocation7 + $0x308] sm:$0xff]  ;;  %v622_v60 = vld [vmem:[#allocation7 + $0x338] sm:$0xff] }
  0xad   :  { %428 = vmatmul.mubr.f32.gmra.mrb[2].mxu1 %v3240_v1  ;;  %v2595_v34 = vpack.c.bf16 %v536_v28, %v531_v27  ;;  %v2463_v27 = vpack.c.bf16 %v604_v18, %v599_v17  ;;  %v665_v17 = vld [vmem:[#allocation7 + $0x490] sm:$0xff] }
  0xae   :  { %2436 = vmatpush1.bf16.msra.mxu1 %v2435_v7 }
  0xaf   :  { %2416 = vmatpush3.bf16.msra.mxu0 %v2415_v35  ;;  %2438 = vmatprep.subr.bf16.mxu1 %v2437_v8  ;;  %v570_v35 = vld [vmem:[#allocation7 + $0x198] sm:$0xff]  ;;  %v600_v8 = vld [vmem:[#allocation7 + $0x288] sm:$0xff] }
  0xb0   :  { %2418 = vmatprep.subr.bf16.mxu0 %v2417_v38  ;;  %v541_v38 = vld [vmem:[#allocation7 + $0xb0] sm:$0xff]  ;;  %v2461_v16 = vpack.c.bf16 %v605_v9, %v600_v8  ;;  %v626_v8 = vld [vmem:[#allocation7 + $0x358] sm:$0xff]  ;;  %v632_v9 = vld [vmem:[#allocation7 + $0x388] sm:$0xff] }
  0xb2   :  { %2440 = vmatpush1.bf16.msra.mxu1 %v2439_v19 }
  0xb3   :  { %2420 = vmatpush3.bf16.msra.mxu0 %v2419_v48  ;;  %2442 = vmatprep.subr.bf16.mxu1 %v2441_v20  ;;  %v2601_v48 = vpack.c.bf16 %v557_v41, %v552_v40  ;;  %v610_v20 = vld [vmem:[#allocation7 + $0x2d8] sm:$0xff]  ;;  %v619_v40 = vld [vmem:[#allocation7 + $0x320] sm:$0xff]  ;;  %v624_v41 = vld [vmem:[#allocation7 + $0x348] sm:$0xff] }
  0xb4   :  { %2422 = vmatprep.subr.bf16.mxu0 %v2421_v52  ;;  %v562_v52 = vld [vmem:[#allocation7 + $0x158] sm:$0xff]  ;;  %v2465_v28 = vpack.c.bf16 %v615_v21, %v610_v20  ;;  %v2471_v50 = vpack.c.bf16 %v624_v41, %v619_v40  ;;  %v636_v20 = vld [vmem:[#allocation7 + $0x3a8] sm:$0xff]  ;;  %v661_v40 = vld [vmem:[#allocation7 + $0x470] sm:$0xff] }
  0xb5   :  { %v2605_v61 = vpack.c.bf16 %v567_v54, %v562_v52  ;;  %v629_v52 = vld [vmem:[#allocation7 + $0x370] sm:$0xff]  ;;  %v634_v54 = vld [vmem:[#allocation7 + $0x398] sm:$0xff] }
  0xb6   :  { %2444 = vmatpush1.bf16.msra.mxu1 %v2443_v30  ;;  %v642_v21 = vld [vmem:[#allocation7 + $0x3d8] sm:$0xff] }
  0xb7   :  { %2424 = vmatpush3.bf16.msra.mxu0 %v2423_v62  ;;  %2446 = vmatprep.subr.bf16.mxu1 %v2445_v31  ;;  %v561_v62 = vld [vmem:[#allocation7 + $0x150] sm:$0xff]  ;;  %v620_v31 = vld [vmem:[#allocation7 + $0x328] sm:$0xff]  ;;  %v666_v41 = vld [vmem:[#allocation7 + $0x498] sm:$0xff] }
  0xb8   :  { %2426 = vmatprep.subr.bf16.mxu0 %v2425_v2  ;;  %v577_v2 = vld [vmem:[#allocation7 + $0x1d0] sm:$0xff]  ;;  %v2607_v7 = vpack.c.bf16 %v566_v63, %v561_v62  ;;  %v2475_v62 = vpack.c.bf16 %v634_v54, %v629_v52  ;;  %v671_v52 = vld [vmem:[#allocation7 + $0x4c0] sm:$0xff] }
  0xb9   :  { %v2609_v10 = vpack.c.bf16 %v577_v2, %v572_v0  ;;  %v639_v0 = vld [vmem:[#allocation7 + $0x3c0] sm:$0xff]  ;;  %v644_v2 = vld [vmem:[#allocation7 + $0x3e8] sm:$0xff] }
  0xba   :  { %2448 = vmatpush1.bf16.msra.mxu1 %v2447_v43 }
  0xbb   :  { %2428 = vmatpush3.bf16.msra.mxu0 %v2427_v11  ;;  %v571_v11 = vld [vmem:[#allocation7 + $0x1a0] sm:$0xff] }
  0xbc   :  { %2590 = vmatprep.subr.bf16.mxu0 %v2589_v14  ;;  %v587_v14 = vld [vmem:[#allocation7 + $0x220] sm:$0xff]  ;;  %v2611_v19 = vpack.c.bf16 %v576_v12, %v571_v11  ;;  %v2479_v11 = vpack.c.bf16 %v644_v2, %v639_v0 }
  0xbd   :  { %v2613_v22 = vpack.c.bf16 %v587_v14, %v582_v13  ;;  %v649_v13 = vld [vmem:[#allocation7 + $0x410] sm:$0xff]  ;;  %v654_v14 = vld [vmem:[#allocation7 + $0x438] sm:$0xff]  ;;  %v252_v2 = vld [vmem:[#allocation10] ss:$8 sm:$0x10] }
  0xbe   :  { %499 = vmatmul.mubr.f32.vlgmr.msra.gmra.mrb[4].mxu0 %v3234_v49  ;;  %v2449_v49 = vpack.c.bf16 %v575_v36, %v570_v35  ;;  %v596_v35 = vld [vmem:[#allocation7 + $0x268] sm:$0xff]  ;;  %v602_v36 = vld [vmem:[#allocation7 + $0x298] sm:$0xff] }
  0xbf   :  { %503 = vmatprep.mubr.f32.mxu0 %v3236_v53  ;;  %2592 = vmatpush1.bf16.msra.mxu0 %v2591_v23  ;;  %v2599_v53 = vpack.c.bf16 %v546_v39, %v541_v38  ;;  %v581_v23 = vld [vmem:[#allocation7 + $0x1f0] sm:$0xff]  ;;  %v2467_v38 = vpack.c.bf16 %v614_v29, %v609_v42  ;;  %v2469_v39 = vpack.c.bf16 %v625_v32, %v620_v31  ;;  %v646_v29 = vld [vmem:[#allocation7 + $0x3f8] sm:$0xff] }
  0xc0   :  { %2594 = vmatprep.subr.bf16.mxu0 %v2593_v26  ;;  %2450 = vmatprep.subr.bf16.mxu1 %v2449_v49  ;;  %v597_v26 = vld [vmem:[#allocation7 + $0x270] sm:$0xff]  ;;  %v2615_v30 = vpack.c.bf16 %v586_v24, %v581_v23  ;;  %v630_v49 = vld [vmem:[#allocation7 + $0x378] sm:$0xff]  ;;  %v2483_v23 = vpack.c.bf16 %v654_v14, %v649_v13 }
  0xc1   :  { %2452 = vmatpush1.bf16.msra.mxu1 %v2451_v55  ;;  %v2617_v33 = vpack.c.bf16 %v597_v26, %v592_v25  ;;  %v2473_v51 = vpack.c.bf16 %v635_v44, %v630_v49  ;;  %v659_v25 = vld [vmem:[#allocation7 + $0x460] sm:$0xff]  ;;  %v664_v26 = vld [vmem:[#allocation7 + $0x488] sm:$0xff]  ;;  %v641_v42 = vld [vmem:[#allocation7 + $0x3d0] sm:$0xff] }
  0xc2   :  { %504 = vmatmul.mubr.f32.gmra.mrb[6].mxu0 %v3240_v1  ;;  %v584_v1 = vld [vmem:[#allocation7 + $0x208] sm:$0xff]  ;;  %2454 = vmatprep.subr.bf16.mxu1 %v2453_v56  ;;  %v657_v31 = vld [vmem:[#allocation7 + $0x450] sm:$0xff]  ;;  %v2487_v32 = vpack.c.bf16 %v664_v26, %v659_v25  ;;  %v670_v49 = vld [vmem:[#allocation7 + $0x4b8] sm:$0xff] }
  0xc3   :  { %2596 = vmatpush1.bf16.msra.mxu0 %v2595_v34  ;;  %v2455_v3 = vpack.c.bf16 %v584_v1, %v579_v57  ;;  %v591_v34 = vld [vmem:[#allocation7 + $0x240] sm:$0xff]  ;;  %v640_v56 = vld [vmem:[#allocation7 + $0x3c8] sm:$0xff]  ;;  %v645_v57 = vld [vmem:[#allocation7 + $0x3f0] sm:$0xff] }
  0xc4   :  { %2598 = vmatprep.subr.bf16.mxu0 %v2597_v37  ;;  %v607_v37 = vld [vmem:[#allocation7 + $0x2c0] sm:$0xff]  ;;  %v2619_v43 = vpack.c.bf16 %v596_v35, %v591_v34  ;;  %v2477_v63 = vpack.c.bf16 %v645_v57, %v640_v56  ;;  %v680_v56 = vld [vmem:[#allocation7 + $0x508] sm:$0xff]  ;;  %v685_v57 = vld [vmem:[#allocation7 + $0x530] sm:$0xff] }
  0xc5   :  { %2456 = vmatpush1.bf16.msra.mxu1 %v2455_v3  ;;  %v2621_v45 = vpack.c.bf16 %v607_v37, %v602_v36  ;;  %v651_v35 = vld [vmem:[#allocation7 + $0x420] sm:$0xff]  ;;  %v656_v36 = vld [vmem:[#allocation7 + $0x448] sm:$0xff]  ;;  %v662_v37 = vld [vmem:[#allocation7 + $0x478] sm:$0xff] }
  0xc6   :  { %2458 = vmatprep.subr.bf16.mxu1 %v2457_v4  ;;  %v650_v4 = vld [vmem:[#allocation7 + $0x418] sm:$0xff]  ;;  %v675_v44 = vld [vmem:[#allocation7 + $0x4e0] sm:$0xff]  ;;  %v681_v13 = vld [vmem:[#allocation7 + $0x510] sm:$0xff] }
  0xc7   :  { %2600 = vmatpush1.bf16.msra.mxu0 %v2599_v53  ;;  %v601_v53 = vld [vmem:[#allocation7 + $0x290] sm:$0xff]  ;;  %v2481_v12 = vpack.c.bf16 %v655_v5, %v650_v4  ;;  %v686_v14 = vld [vmem:[#allocation7 + $0x538] sm:$0xff] }
  0xc8   :  { %2602 = vmatprep.subr.bf16.mxu0 %v2601_v48  ;;  %v617_v48 = vld [vmem:[#allocation7 + $0x310] sm:$0xff]  ;;  %v2623_v55 = vpack.c.bf16 %v606_v46, %v601_v53  ;;  %v2489_v53 = vpack.c.bf16 %v675_v44, %v670_v49 }
  0xc9   :  { %2460 = vmatpush1.bf16.msra.mxu1 %v2459_v15  ;;  %v2625_v1 = vpack.c.bf16 %v617_v48, %v612_v47  ;;  %v677_v46 = vld [vmem:[#allocation7 + $0x4f0] sm:$0xff]  ;;  %v674_v48 = vld [vmem:[#allocation7 + $0x4d8] sm:$0xff] }
  0xca   :  { %2462 = vmatprep.subr.bf16.mxu1 %v2461_v16  ;;  %v660_v16 = vld [vmem:[#allocation7 + $0x468] sm:$0xff]  ;;  %v669_v47 = vld [vmem:[#allocation7 + $0x4b0] sm:$0xff] }
  0xcb   :  { %2604 = vmatpush1.bf16.msra.mxu0 %v2603_v58  ;;  %v611_v58 = vld [vmem:[#allocation7 + $0x2e0] sm:$0xff]  ;;  %v2485_v24 = vpack.c.bf16 %v665_v17, %v660_v16 }
  0xcc   :  { %2606 = vmatprep.subr.bf16.mxu0 %v2605_v61  ;;  %v627_v61 = vld [vmem:[#allocation7 + $0x360] sm:$0xff]  ;;  %v2627_v3 = vpack.c.bf16 %v616_v59, %v611_v58  ;;  %v682_v58 = vld [vmem:[#allocation7 + $0x518] sm:$0xff] }
  0xcd   :  { %2464 = vmatpush1.bf16.msra.mxu1 %v2463_v27  ;;  %v2629_v6 = vpack.c.bf16 %v627_v61, %v622_v60  ;;  %v687_v59 = vld [vmem:[#allocation7 + $0x540] sm:$0xff] }
  0xce   :  { %2466 = vmatprep.subr.bf16.mxu1 %v2465_v28  ;;  %v2653_v61 = vpack.c.bf16 %v687_v59, %v682_v58  ;;  %v251_v0 = vld [vmem:[#allocation10] ss:$8 sm:$0xf] }
  0xcf   :  { %2608 = vmatpush1.bf16.msra.mxu0 %v2607_v7  ;;  %v621_v7 = vld [vmem:[#allocation7 + $0x330] sm:$0xff]  ;;  %v695_v17 = vld [vmem:[#allocation7 + $0x580] sm:$0xff]  ;;  %v716_v58 = vld [vmem:[#allocation7 + $0x628] sm:$0xff] }
  0xd0   :  { %2610 = vmatprep.subr.bf16.mxu0 %v2609_v10  ;;  %v637_v10 = vld [vmem:[#allocation7 + $0x3b0] sm:$0xff]  ;;  %v2631_v15 = vpack.c.bf16 %v626_v8, %v621_v7  ;;  %v720_v59 = vld [vmem:[#allocation7 + $0x648] sm:$0xff] }
  0xd1   :  { %2468 = vmatpush1.bf16.msra.mxu1 %v2467_v38  ;;  %v2633_v18 = vpack.c.bf16 %v637_v10, %v632_v9  ;;  %v667_v38 = vld [vmem:[#allocation7 + $0x4a0] sm:$0xff]  ;;  %v684_v10 = vld [vmem:[#allocation7 + $0x528] sm:$0xff] }
  0xd2   :  { %2470 = vmatprep.subr.bf16.mxu1 %v2469_v39  ;;  %v2643_v39 = vpack.c.bf16 %v656_v36, %v651_v35  ;;  %v679_v9 = vld [vmem:[#allocation7 + $0x500] sm:$0xff] }
  0xd3   :  { %2612 = vmatpush1.bf16.msra.mxu0 %v2611_v19  ;;  %v631_v19 = vld [vmem:[#allocation7 + $0x380] sm:$0xff] }
  0xd4   :  { %2614 = vmatprep.subr.bf16.mxu0 %v2613_v22  ;;  %v647_v22 = vld [vmem:[#allocation7 + $0x400] sm:$0xff]  ;;  %v2635_v27 = vpack.c.bf16 %v636_v20, %v631_v19  ;;  %v697_v19 = vld [vmem:[#allocation7 + $0x590] sm:$0xff] }
  0xd5   :  { %2472 = vmatpush1.bf16.msra.mxu1 %v2471_v50  ;;  %v2637_v28 = vpack.c.bf16 %v647_v22, %v642_v21  ;;  %v2491_v50 = vpack.c.bf16 %v674_v48, %v669_v47  ;;  %v2495_v21 = vpack.c.bf16 %v684_v10, %v679_v9  ;;  %v2655_v22 = vpack.c.bf16 %v686_v14, %v681_v13  ;;  %v707_v35 = vld [vmem:[#allocation7 + $0x5e0] sm:$0xff]  ;;  %v712_v48 = vld [vmem:[#allocation7 + $0x608] sm:$0xff]  ;;  %v730_v13 = vld [vmem:[#allocation7 + $0x698] sm:$0xff] }
  0xd6   :  { %2474 = vmatprep.subr.bf16.mxu1 %v2473_v51  ;;  %v2647_v51 = vpack.c.bf16 %v666_v41, %v661_v40  ;;  %v699_v40 = vld [vmem:[#allocation7 + $0x5a0] sm:$0xff]  ;;  %v704_v41 = vld [vmem:[#allocation7 + $0x5c8] sm:$0xff] }
  0xd7   :  { %2616 = vmatpush1.bf16.msra.mxu0 %v2615_v30  ;;  %v652_v30 = vld [vmem:[#allocation7 + $0x428] sm:$0xff]  ;;  %v715_v47 = vld [vmem:[#allocation7 + $0x620] sm:$0xff] }
  0xd8   :  { %2618 = vmatprep.subr.bf16.mxu0 %v2617_v33  ;;  %v2639_v33 = vpack.c.bf16 %v646_v29, %v641_v42  ;;  %v2641_v34 = vpack.c.bf16 %v657_v31, %v652_v30  ;;  %v691_v42 = vld [vmem:[#allocation7 + $0x560] sm:$0xff]  ;;  %v696_v29 = vld [vmem:[#allocation7 + $0x588] sm:$0xff] }
  0xd9   :  { %2476 = vmatpush1.bf16.msra.mxu1 %v2475_v62  ;;  %v255_v62 = vlaneseq  ;;  %v700_v30 = vld [vmem:[#allocation7 + $0x5a8] sm:$0xff]  ;;  %v735_v14 = vld [vmem:[#allocation7 + $0x6c0] sm:$0xff] }
  0xda   :  { %2478 = vmatprep.subr.bf16.mxu1 %v2477_v63 }
  0xdb   :  { %2620 = vmatpush1.bf16.msra.mxu0 %v2619_v43  ;;  %v2645_v43 = vpack.c.bf16 %v667_v38, %v662_v37  ;;  %v3250_v63 = vshrl.u32 %v255_v62, 7  ;;  %v727_v62 = vld [vmem:[#allocation7 + $0x680] sm:$0xff] }
  0xdc   :  { %2622 = vmatprep.subr.bf16.mxu0 %v2621_v45  ;;  %v672_v45 = vld [vmem:[#allocation7 + $0x4c8] sm:$0xff] }
  0xdd   :  { %2480 = vmatpush1.bf16.msra.mxu1 %v2479_v11  ;;  %v2649_v54 = vpack.c.bf16 %v677_v46, %v672_v45  ;;  %v257_v4 = vsub.s32 0, %v3250_v63  ;;  %v261_v5 = vsub.s32 1, %v3250_v63  ;;  %v701_v45 = vld [vmem:[#allocation7 + $0x5b0] sm:$0xff]  ;;  %v710_v46 = vld [vmem:[#allocation7 + $0x5f8] sm:$0xff] }
  0xde   :  { %2482 = vmatprep.subr.bf16.mxu1 %v2481_v12 }
  0xdf   :  { %2624 = vmatpush1.bf16.msra.mxu0 %v2623_v55  ;;  %v676_v55 = vld [vmem:[#allocation7 + $0x4e8] sm:$0xff] }
  0xe0   :  { %2626 = vmatprep.subr.bf16.mxu0 %v2625_v1  ;;  %v2493_v1 = vpack.c.bf16 %v685_v57, %v680_v56  ;;  %v2651_v60 = vpack.c.bf16 %v676_v55, %v671_v52  ;;  %v714_v55 = vld [vmem:[#allocation7 + $0x618] sm:$0xff]  ;;  %v2505_v56 = vpack.c.bf16 %v715_v47, %v710_v46  ;;  %v757_v46 = vld [vmem:[#allocation7 + $0x770] sm:$0xff] }
  0xe1   :  { %2484 = vmatpush1.bf16.msra.mxu1 %v2483_v23  ;;  %v689_v23 = vld [vmem:[#allocation7 + $0x550] sm:$0xff] }
  0xe2   :  { %2486 = vmatprep.subr.bf16.mxu1 %v2485_v24  ;;  %v694_v24 = vld [vmem:[#allocation7 + $0x578] sm:$0xff] }
  0xe3   :  { %2628 = vmatpush1.bf16.msra.mxu0 %v2627_v3  ;;  %v3252_v3 = vor.u32 %v252_v2, %v251_v0  ;;  %v2499_v38 = vpack.c.bf16 %v694_v24, %v689_v23  ;;  %v2513_v23 = vpack.c.bf16 %v735_v14, %v730_v13  ;;  %v766_v13 = vld [vmem:[#allocation7 + $0x7b8] sm:$0xff] }
  0xe4   :  { %2630 = vmatprep.subr.bf16.mxu0 %v2629_v6  ;;  %v770_v14 = vld [vmem:[#allocation7 + $0x7d8] sm:$0xff] }
  0xe5   :  { %2488 = vmatpush1.bf16.msra.mxu1 %v2487_v32  ;;  %v258_v6 = vrot.slane %v3252_v3, %v257_v4  ;;  %v262_v7 = vrot.slane %v3252_v3, %v261_v5 }
  0xe6   :  { %2490 = vmatprep.subr.bf16.mxu1 %v2489_v53  ;;  %v706_v53 = vld [vmem:[#allocation7 + $0x5d8] sm:$0xff] }
  0xe7   :  { %2632 = vmatpush1.bf16.msra.mxu0 %v2631_v15  ;;  %v690_v15 = vld [vmem:[#allocation7 + $0x558] sm:$0xff]  ;;  %v2663_v52 = vpack.c.bf16 %v706_v53, %v701_v45  ;;  %v755_v45 = vld [vmem:[#allocation7 + $0x760] sm:$0xff]  ;;  %v752_v53 = vld [vmem:[#allocation7 + $0x748] sm:$0xff] }
  0xe8   :  { %2634 = vmatprep.subr.bf16.mxu0 %v2633_v18  ;;  %v692_v18 = vld [vmem:[#allocation7 + $0x568] sm:$0xff] }
  0xe9   :  { %2492 = vmatpush1.bf16.msra.mxu1 %v2491_v50  ;;  %v717_v50 = vld [vmem:[#allocation7 + $0x630] sm:$0xff] }
  0xea   :  { %2494 = vmatprep.subr.bf16.mxu1 %v2493_v1  ;;  %v2665_v57 = vpack.c.bf16 %v717_v50, %v712_v48  ;;  %v711_v1 = vld [vmem:[#allocation7 + $0x600] sm:$0xff] }
  0xeb   :  { %2636 = vmatpush1.bf16.msra.mxu0 %v2635_v27  ;;  %v2497_v27 = vpack.c.bf16 %v695_v17, %v690_v15  ;;  %v2667_v2 = vpack.c.bf16 %v716_v58, %v711_v1  ;;  %v732_v15 = vld [vmem:[#allocation7 + $0x6a8] sm:$0xff]  ;;  %v751_v1 = vld [vmem:[#allocation7 + $0x740] sm:$0xff] }
  0xec   :  { %2638 = vmatprep.subr.bf16.mxu0 %v2637_v28  ;;  %v2657_v28 = vpack.c.bf16 %v697_v19, %v692_v18  ;;  %v729_v19 = vld [vmem:[#allocation7 + $0x690] sm:$0xff]  ;;  %v756_v58 = vld [vmem:[#allocation7 + $0x768] sm:$0xff] }
  0xef   :  { %2640 = vmatpush1.bf16.msra.mxu0 %v2639_v33  ;;  %v705_v33 = vld [vmem:[#allocation7 + $0x5d0] sm:$0xff] }
  0xf0   :  { %2642 = vmatprep.subr.bf16.mxu0 %v2641_v34  ;;  %v702_v34 = vld [vmem:[#allocation7 + $0x5b8] sm:$0xff]  ;;  %v2501_v49 = vpack.c.bf16 %v705_v33, %v700_v30  ;;  %v747_v30 = vld [vmem:[#allocation7 + $0x720] sm:$0xff] }
  0xf1   :  { %v2661_v44 = vpack.c.bf16 %v707_v35, %v702_v34  ;;  %v739_v35 = vld [vmem:[#allocation7 + $0x6e0] sm:$0xff] }
  0xf3   :  { %2644 = vmatpush1.bf16.msra.mxu0 %v2643_v39  ;;  %v2659_v39 = vpack.c.bf16 %v696_v29, %v691_v42  ;;  %v745_v42 = vld [vmem:[#allocation7 + $0x710] sm:$0xff]  ;;  %v742_v29 = vld [vmem:[#allocation7 + $0x6f8] sm:$0xff] }
  0xf4   :  { %2646 = vmatprep.subr.bf16.mxu0 %v2645_v43 }
  0xf7   :  { %2648 = vmatpush1.bf16.msra.mxu0 %v2647_v51  ;;  %v2503_v51 = vpack.c.bf16 %v704_v41, %v699_v40  ;;  %v2677_v40 = vpack.c.bf16 %v747_v30, %v742_v29  ;;  %v741_v41 = vld [vmem:[#allocation7 + $0x6f0] sm:$0xff]  ;;  %v771_v29 = vld [vmem:[#allocation7 + $0x7e0] sm:$0xff]  ;;  %v776_v30 = vld [vmem:[#allocation7 + $0x808] sm:$0xff] }
  0xf8   :  { %2650 = vmatprep.subr.bf16.mxu0 %v2649_v54  ;;  %v709_v54 = vld [vmem:[#allocation7 + $0x5f0] sm:$0xff] }
  0xf9   :  { %v2507_v0 = vpack.c.bf16 %v714_v55, %v709_v54  ;;  %v749_v54 = vld [vmem:[#allocation7 + $0x730] sm:$0xff]  ;;  %v754_v55 = vld [vmem:[#allocation7 + $0x758] sm:$0xff] }
  0xfb   :  { %2652 = vmatpush1.bf16.msra.mxu0 %v2651_v60  ;;  %v725_v60 = vld [vmem:[#allocation7 + $0x670] sm:$0xff] }
  0xfc   :  { %2654 = vmatprep.subr.bf16.mxu0 %v2653_v61  ;;  %v722_v61 = vld [vmem:[#allocation7 + $0x658] sm:$0xff]  ;;  %v2509_v9 = vpack.c.bf16 %v725_v60, %v720_v59  ;;  %v760_v59 = vld [vmem:[#allocation7 + $0x788] sm:$0xff]  ;;  %v765_v60 = vld [vmem:[#allocation7 + $0x7b0] sm:$0xff] }
  0xfd   :  { %v2669_v10 = vpack.c.bf16 %v727_v62, %v722_v61  ;;  %v762_v61 = vld [vmem:[#allocation7 + $0x798] sm:$0xff]  ;;  %v767_v62 = vld [vmem:[#allocation7 + $0x7c0] sm:$0xff] }
 0x171   :  { %v346_v8 = vpop.f32.mrb[0].mxu0 }
 0x172   :  { %v347_v11 = vadd.f32 %v346_v8, %v258_v6  ;;  %v348_v12 = vpop.f32.mrb[1].mxu0  ;;  %v269_v8 = vsub.s32 3, %v3250_v63 }
 0x173   :  { %v349_v16 = vadd.f32 %v348_v12, %v262_v7  ;;  %v726_v12 = vld [vmem:[#allocation7 + $0x678] sm:$0xff] }
 0x174   :  { %v3264_v26 = vmax.f32 %v347_v11, 0.0  ;;  %v721_v11 = vld [vmem:[#allocation7 + $0x650] sm:$0xff] }
 0x175   :  { %v3262_v20 = vmax.f32 %v349_v16, 0.0  ;;  %v352_v25 = vpop.f32.mrb[2].mxu0  ;;  %v737_v16 = vld [vmem:[#allocation7 + $0x6d0] sm:$0xff]  ;;  %v2671_v18 = vpack.c.bf16 %v726_v12, %v721_v11  ;;  %v2685_v11 = vpack.c.bf16 %v767_v62, %v762_v61  ;;  %v791_v61 = vld [vmem:[#allocation7 + $0x880] sm:$0xff]  ;;  %v796_v62 = vld [vmem:[#allocation7 + $0x8a8] sm:$0xff] }
 0x176   :  { %v353_v31 = vadd.f32 %v352_v25, %v258_v6  ;;  %v354_v32 = vpop.f32.mrb[3].mxu0  ;;  %v719_v6 = vld [vmem:[#allocation7 + $0x640] sm:$0xff]  ;;  %v2673_v24 = vpack.c.bf16 %v737_v16, %v732_v15  ;;  %v761_v12 = vld [vmem:[#allocation7 + $0x790] sm:$0xff] }
 0x177   :  { %1013 = vmatprep.mubr.f32.mxu1 %v3262_v20  ;;  %1244 = vmatprep.mubr.f32.mxu0 %v3262_v20  ;;  %v355_v36 = vadd.f32 %v354_v32, %v262_v7  ;;  %v724_v7 = vld [vmem:[#allocation7 + $0x668] sm:$0xff]  ;;  %v731_v25 = vld [vmem:[#allocation7 + $0x6a0] sm:$0xff] }
 0x178   :  { %1014 = vmatmul.mubr.f32.vlgmr.msra.gmra.mrb[4].mxu1 %v3264_v26  ;;  %1245 = vmatmul.mubr.f32.vlgmr.msra.gmra.mrb[8].mxu0 %v3264_v26  ;;  %v3270_v37 = vmax.f32 %v353_v31, 0.0  ;;  %v2511_v17 = vpack.c.bf16 %v724_v7, %v719_v6  ;;  %v759_v6 = vld [vmem:[#allocation7 + $0x780] sm:$0xff]  ;;  %v764_v7 = vld [vmem:[#allocation7 + $0x7a8] sm:$0xff] }
 0x179   :  { %2496 = vmatpush1.bf16.msra.mxu1 %v2495_v21  ;;  %2656 = vmatpush1.bf16.msra.mxu0 %v2655_v22  ;;  %v3272_v43 = vmax.f32 %v355_v36, 0.0  ;;  %v734_v21 = vld [vmem:[#allocation7 + $0x6b8] sm:$0xff]  ;;  %v3282_v22 = vrot.slane %v3252_v3, %v269_v8  ;;  %v744_v36 = vld [vmem:[#allocation7 + $0x708] sm:$0xff]  ;;  %v775_v16 = vld [vmem:[#allocation7 + $0x800] sm:$0xff] }
 0x17a   :  { %2498 = vmatprep.subr.bf16.mxu1 %v2497_v27  ;;  %2658 = vmatprep.subr.bf16.mxu0 %v2657_v28  ;;  %v736_v27 = vld [vmem:[#allocation7 + $0x6c8] sm:$0xff]  ;;  %v2515_v33 = vpack.c.bf16 %v734_v21, %v729_v19  ;;  %v2527_v21 = vpack.c.bf16 %v764_v7, %v759_v6  ;;  %v802_v6 = vld [vmem:[#allocation7 + $0x8d8] sm:$0xff]  ;;  %v807_v7 = vld [vmem:[#allocation7 + $0x900] sm:$0xff] }
 0x17b   :  { %1019 = vmatprep.mubr.f32.mxu1 %v3272_v43  ;;  %1250 = vmatprep.mubr.f32.mxu0 %v3272_v43  ;;  %v740_v28 = vld [vmem:[#allocation7 + $0x6e8] sm:$0xff]  ;;  %v2675_v34 = vpack.c.bf16 %v736_v27, %v731_v25  ;;  %v774_v25 = vld [vmem:[#allocation7 + $0x7f8] sm:$0xff] }
 0x17c   :  { %1020 = vmatmul.mubr.f32.gmra.mrb[6].mxu1 %v3270_v37  ;;  %1251 = vmatmul.mubr.f32.gmra.mrb[10].mxu0 %v3270_v37  ;;  %v3284_v31 = vpop.f32.mrb[0].mxu1 }
 0x17d   :  { %2500 = vmatpush1.bf16.msra.mxu1 %v2499_v38  ;;  %2660 = vmatpush1.bf16.msra.mxu0 %v2659_v39  ;;  %v425_v32 = vpop.f32.mrb[1].mxu1  ;;  %v2517_v39 = vpack.c.bf16 %v745_v42, %v740_v28  ;;  %v2529_v28 = vpack.c.bf16 %v775_v16, %v770_v14  ;;  %v2701_v14 = vpack.c.bf16 %v807_v7, %v802_v6  ;;  %v806_v16 = vld [vmem:[#allocation7 + $0x8f8] sm:$0xff]  ;;  %v840_v6 = vld [vmem:[#allocation7 + $0xa08] sm:$0xff]  ;;  %v845_v7 = vld [vmem:[#allocation7 + $0xa30] sm:$0xff] }
 0x17e   :  { %2502 = vmatprep.subr.bf16.mxu1 %v2501_v49  ;;  %2662 = vmatprep.subr.bf16.mxu0 %v2661_v44  ;;  %v426_v38 = vadd.f32 %v425_v32, %v3282_v22  ;;  %v746_v49 = vld [vmem:[#allocation7 + $0x718] sm:$0xff]  ;;  %v780_v32 = vld [vmem:[#allocation7 + $0x828] sm:$0xff] }
 0x17f   :  { %v750_v44 = vld [vmem:[#allocation7 + $0x738] sm:$0xff] }
 0x180   :  { %v3287_v47 = vmax.f32 %v426_v38, 0.0  ;;  %v3289_v48 = vpop.f32.mrb[2].mxu1 }
 0x181   :  { %2504 = vmatpush1.bf16.msra.mxu1 %v2503_v51  ;;  %2664 = vmatpush1.bf16.msra.mxu0 %v2663_v52  ;;  %v3291_v50 = vpop.f32.mrb[3].mxu1  ;;  %v2519_v51 = vpack.c.bf16 %v744_v36, %v739_v35  ;;  %v2679_v52 = vpack.c.bf16 %v746_v49, %v741_v41  ;;  %v782_v35 = vld [vmem:[#allocation7 + $0x838] sm:$0xff]  ;;  %v787_v36 = vld [vmem:[#allocation7 + $0x860] sm:$0xff]  ;;  %v784_v49 = vld [vmem:[#allocation7 + $0x848] sm:$0xff] }
 0x182   :  { %2506 = vmatprep.subr.bf16.mxu1 %v2505_v56  ;;  %2666 = vmatprep.subr.bf16.mxu0 %v2665_v57  ;;  %v2521_v56 = vpack.c.bf16 %v755_v45, %v750_v44  ;;  %v2681_v57 = vpack.c.bf16 %v757_v46, %v752_v53  ;;  %v779_v41 = vld [vmem:[#allocation7 + $0x820] sm:$0xff]  ;;  %v2693_v45 = vpack.c.bf16 %v787_v36, %v782_v35  ;;  %v781_v53 = vld [vmem:[#allocation7 + $0x830] sm:$0xff]  ;;  %v786_v46 = vld [vmem:[#allocation7 + $0x858] sm:$0xff] }
 0x183   :  { %1090 = vmatprep.mubr.f32.mxu1 %v3287_v47  ;;  %1321 = vmatprep.mubr.f32.mxu0 %v3287_v47  ;;  %v822_v35 = vld [vmem:[#allocation7 + $0x978] sm:$0xff]  ;;  %v827_v36 = vld [vmem:[#allocation7 + $0x9a0] sm:$0xff] }
 0x185   :  { %2508 = vmatpush1.bf16.msra.mxu1 %v2507_v0  ;;  %2668 = vmatpush1.bf16.msra.mxu0 %v2667_v2  ;;  %v2523_v0 = vpack.c.bf16 %v754_v55, %v749_v54  ;;  %v2683_v2 = vpack.c.bf16 %v756_v58, %v751_v1  ;;  %v792_v54 = vld [vmem:[#allocation7 + $0x888] sm:$0xff]  ;;  %v797_v55 = vld [vmem:[#allocation7 + $0x8b0] sm:$0xff]  ;;  %v794_v58 = vld [vmem:[#allocation7 + $0x898] sm:$0xff] }
 0x186   :  { %2510 = vmatprep.subr.bf16.mxu1 %v2509_v9  ;;  %2670 = vmatprep.subr.bf16.mxu0 %v2669_v10  ;;  %v2525_v10 = vpack.c.bf16 %v765_v60, %v760_v59  ;;  %v789_v1 = vld [vmem:[#allocation7 + $0x870] sm:$0xff]  ;;  %v2697_v60 = vpack.c.bf16 %v797_v55, %v792_v54  ;;  %v835_v54 = vld [vmem:[#allocation7 + $0x9e0] sm:$0xff]  ;;  %v832_v55 = vld [vmem:[#allocation7 + $0x9c8] sm:$0xff] }
 0x189   :  { %2512 = vmatpush1.bf16.msra.mxu1 %v2511_v17  ;;  %2672 = vmatpush1.bf16.msra.mxu0 %v2671_v18  ;;  %v772_v17 = vld [vmem:[#allocation7 + $0x7e8] sm:$0xff]  ;;  %v777_v18 = vld [vmem:[#allocation7 + $0x810] sm:$0xff] }
 0x18a   :  { %2514 = vmatprep.subr.bf16.mxu1 %v2513_v23  ;;  %2674 = vmatprep.subr.bf16.mxu0 %v2673_v24  ;;  %v2687_v23 = vpack.c.bf16 %v766_v13, %v761_v12  ;;  %v769_v24 = vld [vmem:[#allocation7 + $0x7d0] sm:$0xff]  ;;  %v2689_v42 = vpack.c.bf16 %v777_v18, %v772_v17  ;;  %v804_v12 = vld [vmem:[#allocation7 + $0x8e8] sm:$0xff]  ;;  %v810_v17 = vld [vmem:[#allocation7 + $0x918] sm:$0xff] }
 0x18b   :  { %v815_v18 = vld [vmem:[#allocation7 + $0x940] sm:$0xff] }
 0x18d   :  { %2516 = vmatpush1.bf16.msra.mxu1 %v2515_v33  ;;  %2676 = vmatpush1.bf16.msra.mxu0 %v2675_v34  ;;  %v785_v34 = vld [vmem:[#allocation7 + $0x850] sm:$0xff] }
 0x18e   :  { %2518 = vmatprep.subr.bf16.mxu1 %v2517_v39  ;;  %2678 = vmatprep.subr.bf16.mxu0 %v2677_v40  ;;  %v2531_v39 = vpack.c.bf16 %v774_v25, %v769_v24  ;;  %v2691_v40 = vpack.c.bf16 %v776_v30, %v771_v29  ;;  %v2533_v44 = vpack.c.bf16 %v785_v34, %v780_v32  ;;  %v811_v30 = vld [vmem:[#allocation7 + $0x920] sm:$0xff]  ;;  %v816_v32 = vld [vmem:[#allocation7 + $0x948] sm:$0xff]  ;;  %v825_v34 = vld [vmem:[#allocation7 + $0x990] sm:$0xff] }
 0x191   :  { %2520 = vmatpush1.bf16.msra.mxu1 %v2519_v51  ;;  %2680 = vmatpush1.bf16.msra.mxu0 %v2679_v52  ;;  %v2005_v9 = vpop.f32.mrb[4].mxu0  ;;  %v790_v51 = vld [vmem:[#allocation7 + $0x878] sm:$0xff]  ;;  %v795_v52 = vld [vmem:[#allocation7 + $0x8a0] sm:$0xff] }
 0x192   :  { %2522 = vmatprep.subr.bf16.mxu1 %v2521_v56  ;;  %2682 = vmatprep.subr.bf16.mxu0 %v2681_v57  ;;  %v2006_v15 = vpop.f32.mrb[5].mxu0  ;;  %v2535_v56 = vpack.c.bf16 %v784_v49, %v779_v41  ;;  %v2695_v57 = vpack.c.bf16 %v786_v46, %v781_v53  ;;  %v2537_v59 = vpack.c.bf16 %v795_v52, %v790_v51  ;;  %v819_v49 = vld [vmem:[#allocation7 + $0x960] sm:$0xff]  ;;  %v821_v46 = vld [vmem:[#allocation7 + $0x970] sm:$0xff]  ;;  %v826_v51 = vld [vmem:[#allocation7 + $0x998] sm:$0xff] }
 0x193   :  { %v3295_v19 = vadd.f32 %v2006_v15, %v2005_v9  ;;  %v2539_v9 = vpack.c.bf16 %v794_v58, %v789_v1  ;;  %v801_v15 = vld [vmem:[#allocation7 + $0x8d0] sm:$0xff]  ;;  %v2707_v41 = vpack.c.bf16 %v816_v32, %v811_v30  ;;  %v2709_v53 = vpack.c.bf16 %v827_v36, %v822_v35  ;;  %v830_v52 = vld [vmem:[#allocation7 + $0x9b8] sm:$0xff]  ;;  %v851_v36 = vld [vmem:[#allocation7 + $0xa60] sm:$0xff] }
 0x194   :  { %v2703_v25 = vpack.c.bf16 %v806_v16, %v801_v15  ;;  %v2711_v58 = vpack.c.bf16 %v826_v51, %v821_v46  ;;  %v844_v15 = vld [vmem:[#allocation7 + $0xa28] sm:$0xff]  ;;  %v2557_v16 = vpack.c.bf16 %v845_v7, %v840_v6  ;;  %v849_v32 = vld [vmem:[#allocation7 + $0xa50] sm:$0xff]  ;;  %v859_v46 = vld [vmem:[#allocation7 + $0xaa0] sm:$0xff] }
 0x195   :  { %2524 = vmatpush1.bf16.msra.mxu1 %v2523_v0  ;;  %2684 = vmatpush1.bf16.msra.mxu0 %v2683_v2  ;;  %v2008_v27 = vpop.f32.mrb[6].mxu0  ;;  %v800_v0 = vld [vmem:[#allocation7 + $0x8c8] sm:$0xff]  ;;  %v805_v2 = vld [vmem:[#allocation7 + $0x8f0] sm:$0xff]  ;;  %v871_v7 = vld [vmem:[#allocation7 + $0xb00] sm:$0xff] }
 0x196   :  { %2526 = vmatprep.subr.bf16.mxu1 %v2525_v10  ;;  %2686 = vmatprep.subr.bf16.mxu0 %v2685_v11  ;;  %v2009_v33 = vpop.f32.mrb[7].mxu0  ;;  %v2699_v10 = vpack.c.bf16 %v796_v62, %v791_v61  ;;  %v799_v11 = vld [vmem:[#allocation7 + $0x8c0] sm:$0xff]  ;;  %v2541_v13 = vpack.c.bf16 %v805_v2, %v800_v0  ;;  %v2553_v61 = vpack.c.bf16 %v835_v54, %v830_v52  ;;  %v836_v2 = vld [vmem:[#allocation7 + $0x9e8] sm:$0xff] }
 0x197   :  { %v3297_v38 = vadd.f32 %v2009_v33, %v2008_v27  ;;  %v2543_v24 = vpack.c.bf16 %v804_v12, %v799_v11  ;;  %v809_v27 = vld [vmem:[#allocation7 + $0x910] sm:$0xff]  ;;  %v820_v33 = vld [vmem:[#allocation7 + $0x968] sm:$0xff]  ;;  %v831_v0 = vld [vmem:[#allocation7 + $0x9c0] sm:$0xff] }
 0x198   :  { %v864_v51 = vld [vmem:[#allocation7 + $0xac8] sm:$0xff] }
 0x199   :  { %2528 = vmatpush1.bf16.msra.mxu1 %v2527_v21  ;;  %2688 = vmatpush1.bf16.msra.mxu0 %v2687_v23  ;;  %v812_v21 = vld [vmem:[#allocation7 + $0x928] sm:$0xff]  ;;  %v817_v23 = vld [vmem:[#allocation7 + $0x950] sm:$0xff] }
 0x19a   :  { %2530 = vmatprep.subr.bf16.mxu1 %v2529_v28  ;;  %2690 = vmatprep.subr.bf16.mxu0 %v2689_v42  ;;  %v814_v28 = vld [vmem:[#allocation7 + $0x938] sm:$0xff]  ;;  %v2545_v42 = vpack.c.bf16 %v815_v18, %v810_v17  ;;  %v2705_v29 = vpack.c.bf16 %v817_v23, %v812_v21  ;;  %v841_v18 = vld [vmem:[#allocation7 + $0xa10] sm:$0xff] }
 0x19b   :  { %v846_v21 = vld [vmem:[#allocation7 + $0xa38] sm:$0xff] }
 0x19c   :  { %v850_v23 = vld [vmem:[#allocation7 + $0xa58] sm:$0xff]  ;;  %v2719_v30 = vpack.c.bf16 %v846_v21, %v841_v18  ;;  %v884_v18 = vld [vmem:[#allocation7 + $0xb68] sm:$0xff] }
 0x19d   :  { %2532 = vmatpush1.bf16.msra.mxu1 %v2531_v39  ;;  %2692 = vmatpush1.bf16.msra.mxu0 %v2691_v40  ;;  %v265_v39 = vsub.s32 2, %v3250_v63  ;;  %v2547_v40 = vpack.c.bf16 %v814_v28, %v809_v27  ;;  %v857_v27 = vld [vmem:[#allocation7 + $0xa90] sm:$0xff]  ;;  %v432_v28 = vadd.f32 %v3291_v50, %v3282_v22  ;;  %v867_v22 = vld [vmem:[#allocation7 + $0xae0] sm:$0xff] }
 0x19e   :  { %2534 = vmatprep.subr.bf16.mxu1 %v2533_v44  ;;  %2694 = vmatprep.subr.bf16.mxu0 %v2693_v45  ;;  %v824_v44 = vld [vmem:[#allocation7 + $0x988] sm:$0xff]  ;;  %v2549_v45 = vpack.c.bf16 %v825_v34, %v820_v33  ;;  %v854_v33 = vld [vmem:[#allocation7 + $0xa78] sm:$0xff] }
 0x19f   :  { %v2551_v1 = vpack.c.bf16 %v824_v44, %v819_v49  ;;  %v865_v49 = vld [vmem:[#allocation7 + $0xad0] sm:$0xff]  ;;  %v862_v44 = vld [vmem:[#allocation7 + $0xab8] sm:$0xff]  ;;  %v3309_v50 = vmax.f32 %v432_v28, 0.0  ;;  %v895_v28 = vld [vmem:[#allocation7 + $0xbc0] sm:$0xff] }
 0x1a0   :  { %v2725_v54 = vpack.c.bf16 %v867_v22, %v862_v44  ;;  %v905_v44 = vld [vmem:[#allocation7 + $0xc10] sm:$0xff]  ;;  %v902_v22 = vld [vmem:[#allocation7 + $0xbf8] sm:$0xff] }
 0x1a1   :  { %2536 = vmatpush1.bf16.msra.mxu1 %v2535_v56  ;;  %2696 = vmatpush1.bf16.msra.mxu0 %v2695_v57  ;;  %v837_v56 = vld [vmem:[#allocation7 + $0x9f0] sm:$0xff]  ;;  %v266_v57 = vrot.slane %v3252_v3, %v265_v39 }
 0x1a2   :  { %2538 = vmatprep.subr.bf16.mxu1 %v2537_v59  ;;  %2698 = vmatprep.subr.bf16.mxu0 %v2697_v60  ;;  %v829_v59 = vld [vmem:[#allocation7 + $0x9b0] sm:$0xff]  ;;  %v834_v60 = vld [vmem:[#allocation7 + $0x9d8] sm:$0xff]  ;;  %v2713_v62 = vpack.c.bf16 %v837_v56, %v832_v55 }
 0x1a3   :  { %v424_v11 = vadd.f32 %v3284_v31, %v266_v57  ;;  %v2555_v12 = vpack.c.bf16 %v834_v60, %v829_v59  ;;  %v861_v55 = vld [vmem:[#allocation7 + $0xab0] sm:$0xff]  ;;  %v866_v56 = vld [vmem:[#allocation7 + $0xad8] sm:$0xff]  ;;  %v2567_v60 = vpack.c.bf16 %v864_v51, %v859_v46 }
 0x1a4   :  { %v877_v59 = vld [vmem:[#allocation7 + $0xb30] sm:$0xff] }
 0x1a5   :  { %2540 = vmatpush1.bf16.msra.mxu1 %v2539_v9  ;;  %2700 = vmatpush1.bf16.msra.mxu0 %v2699_v10  ;;  %v842_v9 = vld [vmem:[#allocation7 + $0xa18] sm:$0xff]  ;;  %v847_v10 = vld [vmem:[#allocation7 + $0xa40] sm:$0xff]  ;;  %v3306_v31 = vmax.f32 %v424_v11, 0.0  ;;  %v885_v11 = vld [vmem:[#allocation7 + $0xb70] sm:$0xff] }
 0x1a6   :  { %2542 = vmatprep.subr.bf16.mxu1 %v2541_v13  ;;  %2702 = vmatprep.subr.bf16.mxu0 %v2701_v14  ;;  %v2715_v13 = vpack.c.bf16 %v836_v2, %v831_v0  ;;  %v839_v14 = vld [vmem:[#allocation7 + $0xa00] sm:$0xff]  ;;  %v2717_v17 = vpack.c.bf16 %v847_v10, %v842_v9  ;;  %v874_v0 = vld [vmem:[#allocation7 + $0xb18] sm:$0xff]  ;;  %v876_v9 = vld [vmem:[#allocation7 + $0xb28] sm:$0xff] }
 0x1a7   :  { %v880_v10 = vld [vmem:[#allocation7 + $0xb48] sm:$0xff] }
 0x1a8   :  { %v2573_v21 = vpack.c.bf16 %v885_v11, %v880_v10  ;;  %v911_v11 = vld [vmem:[#allocation7 + $0xc40] sm:$0xff] }
 0x1a9   :  { %2544 = vmatpush1.bf16.msra.mxu1 %v2543_v24  ;;  %2704 = vmatpush1.bf16.msra.mxu0 %v2703_v25  ;;  %v855_v24 = vld [vmem:[#allocation7 + $0xa80] sm:$0xff]  ;;  %v852_v25 = vld [vmem:[#allocation7 + $0xa68] sm:$0xff] }
 0x1aa   :  { %2546 = vmatprep.subr.bf16.mxu1 %v2545_v42  ;;  %2706 = vmatprep.subr.bf16.mxu0 %v2705_v29  ;;  %v430_v42 = vadd.f32 %v3289_v48, %v266_v57  ;;  %v2559_v29 = vpack.c.bf16 %v844_v15, %v839_v14  ;;  %v2561_v34 = vpack.c.bf16 %v855_v24, %v850_v23  ;;  %v870_v57 = vld [vmem:[#allocation7 + $0xaf8] sm:$0xff]  ;;  %v3129_v14 = vmov 0.0   ;;  %v881_v24 = vld [vmem:[#allocation7 + $0xb50] sm:$0xff] }
 0x1ab   :  { %v2721_v35 = vpack.c.bf16 %v857_v27, %v852_v25  ;;  %v886_v25 = vld [vmem:[#allocation7 + $0xb78] sm:$0xff] }
 0x1ac   :  { %v3313_v48 = vmax.f32 %v430_v42, 0.0  ;;  %v890_v27 = vld [vmem:[#allocation7 + $0xb98] sm:$0xff]  ;;  %v892_v42 = vld [vmem:[#allocation7 + $0xba8] sm:$0xff] }
 0x1ad   :  { %2548 = vmatpush1.bf16.msra.mxu1 %v2547_v40  ;;  %2708 = vmatpush1.bf16.msra.mxu0 %v2707_v41  ;;  %v856_v40 = vld [vmem:[#allocation7 + $0xa88] sm:$0xff] }
 0x1ae   :  { %2550 = vmatprep.subr.bf16.mxu1 %v2549_v45  ;;  %2710 = vmatprep.subr.bf16.mxu0 %v2709_v53  ;;  %v860_v41 = vld [vmem:[#allocation7 + $0xaa8] sm:$0xff]  ;;  %v2563_v45 = vpack.c.bf16 %v854_v33, %v849_v32  ;;  %v2723_v53 = vpack.c.bf16 %v856_v40, %v851_v36  ;;  %v2735_v32 = vpack.c.bf16 %v886_v25, %v881_v24  ;;  %v889_v33 = vld [vmem:[#allocation7 + $0xb90] sm:$0xff]  ;;  %v891_v40 = vld [vmem:[#allocation7 + $0xba0] sm:$0xff] }
 0x1af   :  { %v2565_v52 = vpack.c.bf16 %v865_v49, %v860_v41  ;;  %v896_v41 = vld [vmem:[#allocation7 + $0xbc8] sm:$0xff] }
 0x1b0   :  { %v900_v49 = vld [vmem:[#allocation7 + $0xbe8] sm:$0xff]  ;;  %v2739_v51 = vpack.c.bf16 %v896_v41, %v891_v40  ;;  %v533_v40 = vld [vmem:[#allocation7 + $0x70] sm:$0xff]  ;;  %v538_v41 = vld [vmem:[#allocation7 + $0x98] sm:$0xff] }
 0x1b1   :  { %2552 = vmatpush1.bf16.msra.mxu1 %v2551_v1  ;;  %2712 = vmatpush1.bf16.msra.mxu0 %v2711_v58  ;;  %v875_v1 = vld [vmem:[#allocation7 + $0xb20] sm:$0xff]  ;;  %v872_v58 = vld [vmem:[#allocation7 + $0xb08] sm:$0xff] }
 0x1b2   :  { %2554 = vmatprep.subr.bf16.mxu1 %v2553_v61  ;;  %2714 = vmatprep.subr.bf16.mxu0 %v2713_v62  ;;  %v2727_v61 = vpack.c.bf16 %v866_v56, %v861_v55  ;;  %v869_v62 = vld [vmem:[#allocation7 + $0xaf0] sm:$0xff]  ;;  %v2569_v2 = vpack.c.bf16 %v875_v1, %v870_v57  ;;  %v2729_v6 = vpack.c.bf16 %v877_v59, %v872_v58  ;;  %v906_v1 = vld [vmem:[#allocation7 + $0xc18] sm:$0xff]  ;;  %v915_v59 = vld [vmem:[#allocation7 + $0xc60] sm:$0xff] }
 0x1b3   :  { %v2571_v15 = vpack.c.bf16 %v874_v0, %v869_v62  ;;  %v2581_v55 = vpack.c.bf16 %v905_v44, %v900_v49  ;;  %v901_v57 = vld [vmem:[#allocation7 + $0xbf0] sm:$0xff]  ;;  %v910_v58 = vld [vmem:[#allocation7 + $0xc38] sm:$0xff] }
 0x1b5   :  { %2556 = vmatpush1.bf16.msra.mxu1 %v2555_v12  ;;  %2716 = vmatpush1.bf16.msra.mxu0 %v2715_v13  ;;  %v882_v12 = vld [vmem:[#allocation7 + $0xb58] sm:$0xff]  ;;  %v887_v13 = vld [vmem:[#allocation7 + $0xb80] sm:$0xff] }
 0x1b6   :  { %2558 = vmatprep.subr.bf16.mxu1 %v2557_v16  ;;  %2718 = vmatprep.subr.bf16.mxu0 %v2717_v17  ;;  %v2731_v16 = vpack.c.bf16 %v876_v9, %v871_v7  ;;  %v879_v17 = vld [vmem:[#allocation7 + $0xb40] sm:$0xff]  ;;  %v2733_v23 = vpack.c.bf16 %v887_v13, %v882_v12  ;;  %v914_v7 = vld [vmem:[#allocation7 + $0xc58] sm:$0xff]  ;;  %v2585_v9 = vpack.c.bf16 %v915_v59, %v910_v58  ;;  %v916_v12 = vld [vmem:[#allocation7 + $0xc68] sm:$0xff] }
 0x1b7   :  { %v603_v13 = vld [vmem:[#allocation7 + $0x2a0] sm:$0xff] }
 0x1b8   :  { %1091 = vmatmul.mubr.f32.vlgmr.msra.gmra.mrb[4].mxu1 %v3306_v31  ;;  %1322 = vmatmul.mubr.f32.vlgmr.msra.gmra.mrb[8].mxu0 %v3306_v31  ;;  %v703_v58 = vld [vmem:[#allocation7 + $0x5c0] sm:$0xff] }
 0x1b9   :  { %2560 = vmatpush1.bf16.msra.mxu1 %v2559_v29  ;;  %2720 = vmatpush1.bf16.msra.mxu0 %v2719_v30  ;;  %v897_v29 = vld [vmem:[#allocation7 + $0xbd0] sm:$0xff]  ;;  %v2575_v30 = vpack.c.bf16 %v884_v18, %v879_v17  ;;  %v768_v17 = vld [vmem:[#allocation7 + $0x7c8] sm:$0xff] }
 0x1ba   :  { %2562 = vmatprep.subr.bf16.mxu1 %v2561_v34  ;;  %2722 = vmatprep.subr.bf16.mxu0 %v2721_v35  ;;  %v894_v34 = vld [vmem:[#allocation7 + $0xbb8] sm:$0xff]  ;;  %v2577_v35 = vpack.c.bf16 %v895_v28, %v890_v27  ;;  %v2737_v36 = vpack.c.bf16 %v897_v29, %v892_v42  ;;  %v528_v27 = vld [vmem:[#allocation7 + $0x48] sm:$0xff]  ;;  %v683_v28 = vld [vmem:[#allocation7 + $0x520] sm:$0xff] }
 0x1bb   :  { %1096 = vmatprep.mubr.f32.mxu1 %v3309_v50  ;;  %1327 = vmatprep.mubr.f32.mxu0 %v3309_v50  ;;  %v2579_v46 = vpack.c.bf16 %v894_v34, %v889_v33  ;;  %v688_v42 = vld [vmem:[#allocation7 + $0x548] sm:$0xff]  ;;  %v613_v29 = vld [vmem:[#allocation7 + $0x2f0] sm:$0xff]  ;;  %v618_v33 = vld [vmem:[#allocation7 + $0x318] sm:$0xff] }
 0x1bc   :  { %1097 = vmatmul.mubr.f32.gmra.mrb[6].mxu1 %v3313_v48  ;;  %1328 = vmatmul.mubr.f32.gmra.mrb[10].mxu0 %v3313_v48  ;;  %v773_v34 = vld [vmem:[#allocation7 + $0x7f0] sm:$0xff]  ;;  %v2753_v49 = vpack.c.bf16 %v618_v33, %v613_v29  ;;  %v658_v29 = vld [vmem:[#allocation7 + $0x458] sm:$0xff] }
 0x1bd   :  { %2564 = vmatpush1.bf16.msra.mxu1 %v2563_v45  ;;  %2724 = vmatpush1.bf16.msra.mxu0 %v2723_v53  ;;  %v907_v45 = vld [vmem:[#allocation7 + $0xc20] sm:$0xff]  ;;  %v273_v53 = vsub.s32 4, %v3250_v63  ;;  %v818_v33 = vld [vmem:[#allocation7 + $0x958] sm:$0xff] }
 0x1be   :  { %2566 = vmatprep.subr.bf16.mxu1 %v2565_v52  ;;  %2726 = vmatprep.subr.bf16.mxu0 %v2725_v54  ;;  %v899_v52 = vld [vmem:[#allocation7 + $0xbe0] sm:$0xff]  ;;  %v904_v54 = vld [vmem:[#allocation7 + $0xc08] sm:$0xff]  ;;  %v2741_v56 = vpack.c.bf16 %v907_v45, %v902_v22  ;;  %v693_v22 = vld [vmem:[#allocation7 + $0x570] sm:$0xff] }
 0x1bf   :  { %1167 = vmatprep.mubr.f32.mxu1 %v3129_v14  ;;  %1398 = vmatprep.mubr.f32.mxu0 %v3129_v14  ;;  %v274_v62 = vrot.slane %v3252_v3, %v273_v53  ;;  %v2583_v0 = vpack.c.bf16 %v904_v54, %v899_v52  ;;  %v698_v45 = vld [vmem:[#allocation7 + $0x598] sm:$0xff]  ;;  %v783_v52 = vld [vmem:[#allocation7 + $0x840] sm:$0xff]  ;;  %v788_v54 = vld [vmem:[#allocation7 + $0x868] sm:$0xff] }
 0x1c1   :  { %2568 = vmatpush1.bf16.msra.mxu1 %v2567_v60  ;;  %2728 = vmatpush1.bf16.msra.mxu0 %v2727_v61  ;;  %v912_v60 = vld [vmem:[#allocation7 + $0xc48] sm:$0xff]  ;;  %v917_v61 = vld [vmem:[#allocation7 + $0xc70] sm:$0xff]  ;;  %v501_v18 = vadd.f32 %v3295_v19, %v274_v62  ;;  %v778_v19 = vld [vmem:[#allocation7 + $0x818] sm:$0xff] }
 0x1c2   :  { %2570 = vmatprep.subr.bf16.mxu1 %v2569_v2  ;;  %2730 = vmatprep.subr.bf16.mxu0 %v2729_v6  ;;  %v2743_v2 = vpack.c.bf16 %v906_v1, %v901_v57  ;;  %v909_v6 = vld [vmem:[#allocation7 + $0xc30] sm:$0xff]  ;;  %v2745_v10 = vpack.c.bf16 %v917_v61, %v912_v60  ;;  %v2785_v44 = vpack.c.bf16 %v778_v19, %v773_v34  ;;  %v543_v57 = vld [vmem:[#allocation7 + $0xc0] sm:$0xff]  ;;  %v548_v1 = vld [vmem:[#allocation7 + $0xe8] sm:$0xff] }
 0x1c3   :  { %v2587_v3 = vpack.c.bf16 %v914_v7, %v909_v6  ;;  %v2789_v60 = vpack.c.bf16 %v788_v54, %v783_v52  ;;  %v708_v61 = vld [vmem:[#allocation7 + $0x5e8] sm:$0xff]  ;;  %v798_v6 = vld [vmem:[#allocation7 + $0x8b8] sm:$0xff] }
 0x1c4   :  { %v2791_v7 = vpack.c.bf16 %v708_v61, %v703_v58  ;;  %v678_v61 = vld [vmem:[#allocation7 + $0x4f8] sm:$0xff] }
 0x1c5   :  { %2572 = vmatpush1.bf16.msra.mxu1 %v2571_v15  ;;  %2732 = vmatpush1.bf16.msra.mxu0 %v2731_v16  ;;  %v608_v15 = vld [vmem:[#allocation7 + $0x2c8] sm:$0xff]  ;;  %v763_v16 = vld [vmem:[#allocation7 + $0x7a0] sm:$0xff] }
 0x1c6   :  { %2574 = vmatprep.subr.bf16.mxu1 %v2573_v21  ;;  %2734 = vmatprep.subr.bf16.mxu0 %v2733_v23  ;;  %v2747_v21 = vpack.c.bf16 %v916_v12, %v911_v11  ;;  %v523_v23 = vld [vmem:[#allocation7 + $0x20] sm:$0xff]  ;;  %v2749_v24 = vpack.c.bf16 %v608_v15, %v603_v13  ;;  %v2781_v25 = vpack.c.bf16 %v768_v17, %v763_v16  ;;  %v558_v11 = vld [vmem:[#allocation7 + $0x138] sm:$0xff]  ;;  %v713_v12 = vld [vmem:[#allocation7 + $0x610] sm:$0xff] }
 0x1c7   :  { %v718_v15 = vld [vmem:[#allocation7 + $0x638] sm:$0xff]  ;;  %v643_v16 = vld [vmem:[#allocation7 + $0x3e0] sm:$0xff]  ;;  %v648_v17 = vld [vmem:[#allocation7 + $0x408] sm:$0xff] }
 0x1c9   :  { %2576 = vmatpush1.bf16.msra.mxu1 %v2575_v30  ;;  %2736 = vmatpush1.bf16.msra.mxu0 %v2735_v32  ;;  %v3326_v30 = vmax.f32 %v501_v18, 0.0  ;;  %v506_v32 = vadd.f32 %v3297_v38, %v274_v62  ;;  %v628_v38 = vld [vmem:[#allocation7 + $0x368] sm:$0xff]  ;;  %v633_v62 = vld [vmem:[#allocation7 + $0x390] sm:$0xff]  ;;  %v803_v18 = vld [vmem:[#allocation7 + $0x8e0] sm:$0xff] }
 0x1ca   :  { %2578 = vmatprep.subr.bf16.mxu1 %v2577_v35  ;;  %2738 = vmatprep.subr.bf16.mxu0 %v2737_v36  ;;  %v2751_v35 = vpack.c.bf16 %v528_v27, %v523_v23  ;;  %v2783_v36 = vpack.c.bf16 %v688_v42, %v683_v28  ;;  %v2765_v23 = vpack.c.bf16 %v648_v17, %v643_v16  ;;  %v728_v28 = vld [vmem:[#allocation7 + $0x688] sm:$0xff]  ;;  %v653_v42 = vld [vmem:[#allocation7 + $0x430] sm:$0xff]  ;;  %v1662_v16 = vld [vmem:[#allocation8 + $0x80] sm:$0xff] }
 0x1cb   :  { %v1663_v17 = vld [vmem:[#allocation8 + $0x88] sm:$0xff] }
 0x1cd   :  { %2580 = vmatpush1.bf16.msra.mxu1 %v2579_v46  ;;  %2740 = vmatpush1.bf16.msra.mxu0 %v2739_v51  ;;  %v623_v46 = vld [vmem:[#allocation7 + $0x340] sm:$0xff]  ;;  %v3329_v51 = vmax.f32 %v506_v32, 0.0  ;;  %v813_v32 = vld [vmem:[#allocation7 + $0x930] sm:$0xff] }
 0x1ce   :  { %2582 = vmatprep.subr.bf16.mxu1 %v2581_v55  ;;  %2742 = vmatprep.subr.bf16.mxu0 %v2741_v56  ;;  %v2755_v55 = vpack.c.bf16 %v538_v41, %v533_v40  ;;  %v2787_v56 = vpack.c.bf16 %v698_v45, %v693_v22  ;;  %v2757_v59 = vpack.c.bf16 %v628_v38, %v623_v46  ;;  %v578_v40 = vld [vmem:[#allocation7 + $0x1d8] sm:$0xff]  ;;  %v733_v41 = vld [vmem:[#allocation7 + $0x6b0] sm:$0xff]  ;;  %v663_v22 = vld [vmem:[#allocation7 + $0x480] sm:$0xff] }
 0x1cf   :  { %v668_v45 = vld [vmem:[#allocation7 + $0x4a8] sm:$0xff]  ;;  %v823_v46 = vld [vmem:[#allocation7 + $0x980] sm:$0xff] }
 0x1d0   :  { %v828_v38 = vld [vmem:[#allocation7 + $0x9a8] sm:$0xff] }
 0x1d1   :  { %2584 = vmatpush1.bf16.msra.mxu1 %v2583_v0  ;;  %2744 = vmatpush1.bf16.msra.mxu0 %v2743_v2  ;;  %v638_v0 = vld [vmem:[#allocation7 + $0x3b8] sm:$0xff]  ;;  %v793_v2 = vld [vmem:[#allocation7 + $0x890] sm:$0xff]  ;;  %v2805_v58 = vpack.c.bf16 %v828_v38, %v823_v46  ;;  %v1651_v46 = vld [vmem:[#allocation8 + $0x28] sm:$0xff] }
 0x1d2   :  { %2586 = vmatprep.subr.bf16.mxu1 %v2585_v9  ;;  %2746 = vmatprep.subr.bf16.mxu0 %v2745_v10  ;;  %v2761_v9 = vpack.c.bf16 %v638_v0, %v633_v62  ;;  %v553_v10 = vld [vmem:[#allocation7 + $0x110] sm:$0xff]  ;;  %v2793_v13 = vpack.c.bf16 %v798_v6, %v793_v2  ;;  %v838_v0 = vld [vmem:[#allocation7 + $0x9f8] sm:$0xff]  ;;  %v883_v38 = vld [vmem:[#allocation7 + $0xb60] sm:$0xff] }
 0x1d3   :  { %v833_v62 = vld [vmem:[#allocation7 + $0x9d0] sm:$0xff] }
 0x1d5   :  { %2588 = vmatpush1.bf16.msra.mxu1 %v2587_v3  ;;  %2748 = vmatpush1.bf16.msra.mxu0 %v2747_v21  ;;  %v808_v3 = vld [vmem:[#allocation7 + $0x908] sm:$0xff]  ;;  %v2763_v21 = vpack.c.bf16 %v558_v11, %v553_v10  ;;  %v753_v10 = vld [vmem:[#allocation7 + $0x750] sm:$0xff]  ;;  %v2809_v11 = vpack.c.bf16 %v838_v0, %v833_v62 }
 0x1d6   :  { %2750 = vmatprep.subr.bf16.mxu1 %v2749_v24  ;;  %2782 = vmatprep.subr.bf16.mxu0 %v2781_v25  ;;  %v568_v24 = vld [vmem:[#allocation7 + $0x188] sm:$0xff]  ;;  %v723_v25 = vld [vmem:[#allocation7 + $0x660] sm:$0xff]  ;;  %v2797_v27 = vpack.c.bf16 %v808_v3, %v803_v18  ;;  %v1672_v0 = vld [vmem:[#allocation8 + $0xd0] sm:$0xff] }
 0x1d7   :  { %v2799_v19 = vpack.c.bf16 %v728_v28, %v723_v25  ;;  %v1647_v25 = vld [vmem:[#allocation8 + $0x8] sm:$0xff]  ;;  %v1665_v28 = vld [vmem:[#allocation8 + $0x98] sm:$0xff] }
 0x1d8   :  { %1168 = vmatmul.mubr.f32.vlgmr.msra.gmra.mrb[4].mxu1 %v3326_v30  ;;  %1399 = vmatmul.mubr.f32.vlgmr.msra.gmra.mrb[8].mxu0 %v3326_v30  ;;  %v1655_v62 = vld [vmem:[#allocation8 + $0x48] sm:$0xff] }
 0x1d9   :  { %2752 = vmatpush3.bf16.msra.mxu1 %v2751_v35  ;;  %2784 = vmatpush3.bf16.msra.mxu0 %v2783_v36  ;;  %v2769_v35 = vpack.c.bf16 %v658_v29, %v653_v42  ;;  %v573_v36 = vld [vmem:[#allocation7 + $0x1b0] sm:$0xff]  ;;  %v863_v29 = vld [vmem:[#allocation7 + $0xac0] sm:$0xff] }
 0x1da   :  { %1173 = vmatprep.mubr.f32.mxu1 %v3129_v14  ;;  %1404 = vmatprep.mubr.f32.mxu0 %v3129_v14  ;;  %v2759_v14 = vpack.c.bf16 %v548_v1, %v543_v57  ;;  %v2771_v52 = vpack.c.bf16 %v578_v40, %v573_v36  ;;  %v588_v57 = vld [vmem:[#allocation7 + $0x228] sm:$0xff]  ;;  %v743_v1 = vld [vmem:[#allocation7 + $0x700] sm:$0xff] }
 0x1db   :  { %2754 = vmatprep.subr.bf16.mxu1 %v2753_v49  ;;  %2786 = vmatprep.subr.bf16.mxu0 %v2785_v44  ;;  %v2801_v49 = vpack.c.bf16 %v818_v33, %v813_v32  ;;  %v738_v44 = vld [vmem:[#allocation7 + $0x6d8] sm:$0xff]  ;;  %v868_v33 = vld [vmem:[#allocation7 + $0xae8] sm:$0xff]  ;;  %v1666_v36 = vld [vmem:[#allocation8 + $0xa0] sm:$0xff] }
 0x1dc   :  { %1174 = vmatmul.mubr.f32.gmra.mrb[6].mxu1 %v3329_v51  ;;  %1405 = vmatmul.mubr.f32.gmra.mrb[10].mxu0 %v3329_v51  ;;  %v2803_v54 = vpack.c.bf16 %v738_v44, %v733_v41  ;;  %v1667_v40 = vld [vmem:[#allocation8 + $0xa8] sm:$0xff]  ;;  %v2821_v41 = vpack.c.bf16 %v868_v33, %v863_v29  ;;  %v1680_v33 = vld [vmem:[#allocation8 + $0x110] sm:$0xff] }
 0x1dd   :  { %2756 = vmatpush3.bf16.msra.mxu1 %v2755_v55  ;;  %1475 = vmatprep.mubr.f32.mxu1 %v3262_v20  ;;  %v2795_v20 = vpack.c.bf16 %v718_v15, %v713_v12  ;;  %v2773_v55 = vpack.c.bf16 %v668_v45, %v663_v22  ;;  %v758_v12 = vld [vmem:[#allocation7 + $0x778] sm:$0xff]  ;;  %v848_v15 = vld [vmem:[#allocation7 + $0xa48] sm:$0xff]  ;;  %v2853_v22 = vpack.c.bf16 %v1667_v40, %v1666_v36  ;;  %v1650_v45 = vld [vmem:[#allocation8 + $0x20] sm:$0xff] }
 0x1de   :  { %2788 = vmatpush3.bf16.msra.mxu0 %v2787_v56  ;;  %1550 = vmatprep.mubr.f32.mxu0 %v3287_v47  ;;  %v563_v47 = vld [vmem:[#allocation7 + $0x160] sm:$0xff]  ;;  %v2811_v3 = vpack.c.bf16 %v758_v12, %v753_v10  ;;  %v1657_v12 = vld [vmem:[#allocation8 + $0x58] sm:$0xff] }
 0x1df   :  { %2758 = vmatprep.subr.bf16.mxu1 %v2757_v59  ;;  %2790 = vmatprep.subr.bf16.mxu0 %v2789_v60  ;;  %v2767_v34 = vpack.c.bf16 %v568_v24, %v563_v47  ;;  %v583_v56 = vld [vmem:[#allocation7 + $0x200] sm:$0xff]  ;;  %v748_v59 = vld [vmem:[#allocation7 + $0x728] sm:$0xff]  ;;  %v673_v60 = vld [vmem:[#allocation7 + $0x4d0] sm:$0xff] }
 0x1e0   :  { %v2775_v2 = vpack.c.bf16 %v588_v57, %v583_v56  ;;  %v2807_v6 = vpack.c.bf16 %v748_v59, %v743_v1  ;;  %v858_v47 = vld [vmem:[#allocation7 + $0xa98] sm:$0xff]  ;;  %v1646_v24 = vld [vmem:[#allocation8] sm:$0xff]  ;;  %v1671_v1 = vld [vmem:[#allocation8 + $0xc8] sm:$0xff] }
 0x1e1   :  { %2760 = vmatpush3.bf16.msra.mxu1 %v2759_v14  ;;  %v2777_v14 = vpack.c.bf16 %v678_v61, %v673_v60  ;;  %v2847_v32 = vpack.c.bf16 %v1647_v25, %v1646_v24  ;;  %v1653_v56 = vld [vmem:[#allocation8 + $0x38] sm:$0xff]  ;;  %v1670_v57 = vld [vmem:[#allocation8 + $0xc0] sm:$0xff] }
 0x1e2   :  { %2792 = vmatpush3.bf16.msra.mxu0 %v2791_v7  ;;  %2762 = vmatprep.subr.bf16.mxu1 %v2761_v9  ;;  %v593_v7 = vld [vmem:[#allocation7 + $0x250] sm:$0xff]  ;;  %v598_v9 = vld [vmem:[#allocation7 + $0x278] sm:$0xff]  ;;  %v2861_v60 = vpack.c.bf16 %v1671_v1, %v1670_v57  ;;  %v1654_v61 = vld [vmem:[#allocation8 + $0x40] sm:$0xff] }
 0x1e3   :  { %2794 = vmatprep.subr.bf16.mxu0 %v2793_v13  ;;  %v843_v13 = vld [vmem:[#allocation7 + $0xa20] sm:$0xff]  ;;  %v2779_v18 = vpack.c.bf16 %v598_v9, %v593_v7  ;;  %v898_v59 = vld [vmem:[#allocation7 + $0xbd8] sm:$0xff]  ;;  %v2863_v7 = vpack.c.bf16 %v1655_v62, %v1654_v61  ;;  %v908_v9 = vld [vmem:[#allocation7 + $0xc28] sm:$0xff] }
 0x1e4   :  { %v1678_v25 = vld [vmem:[#allocation8 + $0x100] sm:$0xff]  ;;  %v1688_v1 = vld [vmem:[#allocation8 + $0x150] sm:$0xff] }
 0x1e5   :  { %2764 = vmatpush3.bf16.msra.mxu1 %v2763_v21  ;;  %v2813_v21 = vpack.c.bf16 %v848_v15, %v843_v13  ;;  %v1674_v13 = vld [vmem:[#allocation8 + $0xe0] sm:$0xff]  ;;  %v1675_v15 = vld [vmem:[#allocation8 + $0xe8] sm:$0xff] }
 0x1e6   :  { %2796 = vmatpush3.bf16.msra.mxu0 %v2795_v20  ;;  %2766 = vmatprep.subr.bf16.mxu1 %v2765_v23  ;;  %v853_v20 = vld [vmem:[#allocation7 + $0xa70] sm:$0xff]  ;;  %v2845_v23 = vpack.c.bf16 %v1663_v17, %v1662_v16 }
 0x1e7   :  { %2798 = vmatprep.subr.bf16.mxu0 %v2797_v27  ;;  %v1664_v27 = vld [vmem:[#allocation8 + $0x90] sm:$0xff]  ;;  %v2817_v42 = vpack.c.bf16 %v858_v47, %v853_v20  ;;  %v1695_v47 = vld [vmem:[#allocation8 + $0x188] sm:$0xff] }
 0x1e9   :  { %2768 = vmatpush3.bf16.msra.mxu1 %v2767_v34  ;;  %v2849_v34 = vpack.c.bf16 %v1665_v28, %v1664_v27  ;;  %v1679_v27 = vld [vmem:[#allocation8 + $0x108] sm:$0xff]  ;;  %v1696_v28 = vld [vmem:[#allocation8 + $0x190] sm:$0xff] }
 0x1ea   :  { %2800 = vmatpush3.bf16.msra.mxu0 %v2799_v19  ;;  %2770 = vmatprep.subr.bf16.mxu1 %v2769_v35  ;;  %v1648_v19 = vld [vmem:[#allocation8 + $0x10] sm:$0xff]  ;;  %v1649_v35 = vld [vmem:[#allocation8 + $0x18] sm:$0xff]  ;;  %v2879_v29 = vpack.c.bf16 %v1679_v27, %v1678_v25  ;;  %v921_v25 = vld [vmem:[#allocation10 + $0x1] ss:$8 sm:$0x10] }
 0x1eb   :  { %2802 = vmatprep.subr.bf16.mxu0 %v2801_v49  ;;  %v873_v49 = vld [vmem:[#allocation7 + $0xb10] sm:$0xff]  ;;  %v2851_v44 = vpack.c.bf16 %v1649_v35, %v1648_v19  ;;  %v1698_v19 = vld [vmem:[#allocation8 + $0x1a0] sm:$0xff]  ;;  %v1699_v35 = vld [vmem:[#allocation8 + $0x1a8] sm:$0xff] }
 0x1ec   :  { %v2885_v40 = vpack.c.bf16 %v1699_v35, %v1698_v19 }
 0x1ed   :  { %2772 = vmatpush3.bf16.msra.mxu1 %v2771_v52  ;;  %v2855_v52 = vpack.c.bf16 %v1651_v46, %v1650_v45  ;;  %v1684_v46 = vld [vmem:[#allocation8 + $0x130] sm:$0xff] }
 0x1ee   :  { %2804 = vmatpush3.bf16.msra.mxu0 %v2803_v54  ;;  %2774 = vmatprep.subr.bf16.mxu1 %v2773_v55  ;;  %v888_v54 = vld [vmem:[#allocation7 + $0xb88] sm:$0xff]  ;;  %v1652_v55 = vld [vmem:[#allocation8 + $0x30] sm:$0xff] }
 0x1ef   :  { %2806 = vmatprep.subr.bf16.mxu0 %v2805_v58  ;;  %v893_v58 = vld [vmem:[#allocation7 + $0xbb0] sm:$0xff] }
 0x1f1   :  { %2776 = vmatpush3.bf16.msra.mxu1 %v2775_v2  ;;  %v1673_v2 = vld [vmem:[#allocation8 + $0xd8] sm:$0xff] }
 0x1f2   :  { %2808 = vmatpush3.bf16.msra.mxu0 %v2807_v6  ;;  %2778 = vmatprep.subr.bf16.mxu1 %v2777_v14  ;;  %v2833_v6 = vpack.c.bf16 %v898_v59, %v893_v58  ;;  %v903_v14 = vld [vmem:[#allocation7 + $0xc00] sm:$0xff]  ;;  %v2865_v10 = vpack.c.bf16 %v1673_v2, %v1672_v0 }
 0x1f3   :  { %2810 = vmatprep.subr.bf16.mxu0 %v2809_v11  ;;  %v1656_v11 = vld [vmem:[#allocation8 + $0x50] sm:$0xff]  ;;  %v2837_v16 = vpack.c.bf16 %v908_v9, %v903_v14  ;;  %v1706_v58 = vld [vmem:[#allocation8 + $0x1e0] sm:$0xff] }
 0x1f4   :  { %v2867_v17 = vpack.c.bf16 %v1657_v12, %v1656_v11  ;;  %v1658_v59 = vld [vmem:[#allocation8 + $0x60] sm:$0xff]  ;;  %v1676_v14 = vld [vmem:[#allocation8 + $0xf0] sm:$0xff]  ;;  %v1709_v11 = vld [vmem:[#allocation8 + $0x1f8] sm:$0xff] }
 0x1f5   :  { %2780 = vmatpush3.bf16.msra.mxu1 %v2779_v18  ;;  %v913_v18 = vld [vmem:[#allocation7 + $0xc50] sm:$0xff]  ;;  %v1690_v2 = vld [vmem:[#allocation8 + $0x160] sm:$0xff] }
 0x1f6   :  { %2812 = vmatpush3.bf16.msra.mxu0 %v2811_v3  ;;  %2814 = vmatprep.subr.bf16.mxu1 %v2813_v21  ;;  %v918_v3 = vld [vmem:[#allocation7 + $0xc78] sm:$0xff]  ;;  %v1708_v9 = vld [vmem:[#allocation8 + $0x1f0] sm:$0xff] }
 0x1f7   :  { %2846 = vmatprep.subr.bf16.mxu0 %v2845_v23  ;;  %v2841_v20 = vpack.c.bf16 %v918_v3, %v913_v18  ;;  %v1694_v23 = vld [vmem:[#allocation8 + $0x180] sm:$0xff]  ;;  %v1660_v12 = vld [vmem:[#allocation8 + $0x70] sm:$0xff]  ;;  %v1693_v3 = vld [vmem:[#allocation8 + $0x178] sm:$0xff] }
 0x1f8   :  { %1476 = vmatmul.mubr.f32.vlgmr.msra.gmra.mrb[8].mxu1 %v3264_v26  ;;  %v878_v26 = vld [vmem:[#allocation7 + $0xb38] sm:$0xff]  ;;  %v2877_v24 = vpack.c.bf16 %v1695_v47, %v1694_v23  ;;  %v1692_v18 = vld [vmem:[#allocation8 + $0x170] sm:$0xff]  ;;  %v1711_v23 = vld [vmem:[#allocation8 + $0x208] sm:$0xff] }
 0x1f9   :  { %1551 = vmatmul.mubr.f32.vlgmr.msra.gmra.mrb[12].mxu0 %v3306_v31  ;;  %1480 = vmatprep.mubr.f32.mxu1 %v3272_v43  ;;  %v1668_v43 = vld [vmem:[#allocation8 + $0xb0] sm:$0xff]  ;;  %v1669_v31 = vld [vmem:[#allocation8 + $0xb8] sm:$0xff] }
 0x1fa   :  { %1555 = vmatprep.mubr.f32.mxu0 %v3309_v50  ;;  %2816 = vmatpush3.bf16.msra.mxu1 %v2813_v21  ;;  %v2825_v50 = vpack.c.bf16 %v878_v26, %v873_v49  ;;  %v2869_v21 = vpack.c.bf16 %v1675_v15, %v1674_v13  ;;  %v1683_v49 = vld [vmem:[#allocation8 + $0x128] sm:$0xff]  ;;  %v1701_v26 = vld [vmem:[#allocation8 + $0x1b8] sm:$0xff] }
 0x1fb   :  { %2818 = vmatprep.subr.bf16.mxu1 %v2817_v42  ;;  %2848 = vmatpush3.bf16.msra.mxu0 %v2847_v32  ;;  %v1661_v13 = vld [vmem:[#allocation8 + $0x78] sm:$0xff] }
 0x1fc   :  { %1481 = vmatmul.mubr.f32.gmra.mrb[10].mxu1 %v3270_v37  ;;  %2850 = vmatprep.subr.bf16.mxu0 %v2849_v34  ;;  %v2857_v37 = vpack.c.bf16 %v1669_v31, %v1668_v43  ;;  %v1681_v34 = vld [vmem:[#allocation8 + $0x118] sm:$0xff]  ;;  %v1702_v31 = vld [vmem:[#allocation8 + $0x1c0] sm:$0xff] }
 0x1fd   :  { %1556 = vmatmul.mubr.f32.gmra.mrb[14].mxu0 %v3313_v48  ;;  %2231 = vmatprep.mubr.f32.mxu1 %v3326_v30  ;;  %v2829_v48 = vpack.c.bf16 %v888_v54, %v883_v38  ;;  %v2859_v30 = vpack.c.bf16 %v1653_v56, %v1652_v55  ;;  %v2883_v36 = vpack.c.bf16 %v1681_v34, %v1680_v33  ;;  %v1685_v43 = vld [vmem:[#allocation8 + $0x138] sm:$0xff]  ;;  %v1687_v54 = vld [vmem:[#allocation8 + $0x148] sm:$0xff] }
 0x1fe   :  { %2820 = vmatpush3.bf16.msra.mxu1 %v2817_v42  ;;  %v1697_v42 = vld [vmem:[#allocation8 + $0x198] sm:$0xff]  ;;  %v2891_v38 = vpack.c.bf16 %v1685_v43, %v1684_v46 }
 0x1ff   :  { %2822 = vmatprep.subr.bf16.mxu1 %v2821_v41  ;;  %2852 = vmatpush3.bf16.msra.mxu0 %v2851_v44  ;;  %v2881_v32 = vpack.c.bf16 %v1697_v42, %v1696_v28  ;;  %v1700_v44 = vld [vmem:[#allocation8 + $0x1b0] sm:$0xff]  ;;  %v1705_v55 = vld [vmem:[#allocation8 + $0x1d8] sm:$0xff] }
 0x200   :  { %2854 = vmatprep.subr.bf16.mxu0 %v2853_v22  ;;  %v2889_v45 = vpack.c.bf16 %v1701_v26, %v1700_v44 }
 0x202   :  { %2824 = vmatpush3.bf16.msra.mxu1 %v2821_v41  ;;  %v1682_v41 = vld [vmem:[#allocation8 + $0x120] sm:$0xff] }
 0x203   :  { %2826 = vmatprep.subr.bf16.mxu1 %v2825_v50  ;;  %2856 = vmatpush3.bf16.msra.mxu0 %v2855_v52  ;;  %v2887_v22 = vpack.c.bf16 %v1683_v49, %v1682_v41  ;;  %v1686_v52 = vld [vmem:[#allocation8 + $0x140] sm:$0xff]  ;;  %v1712_v41 = vld [vmem:[#allocation8 + $0x210] sm:$0xff] }
 0x204   :  { %2858 = vmatprep.subr.bf16.mxu0 %v2857_v37  ;;  %v1704_v37 = vld [vmem:[#allocation8 + $0x1d0] sm:$0xff]  ;;  %v2895_v56 = vpack.c.bf16 %v1687_v54, %v1686_v52  ;;  %v1714_v54 = vld [vmem:[#allocation8 + $0x220] sm:$0xff] }
 0x205   :  { %v2897_v57 = vpack.c.bf16 %v1705_v55, %v1704_v37  ;;  %v1715_v37 = vld [vmem:[#allocation8 + $0x228] sm:$0xff] }
 0x206   :  { %2828 = vmatpush3.bf16.msra.mxu1 %v2825_v50  ;;  %v1703_v50 = vld [vmem:[#allocation8 + $0x1c8] sm:$0xff] }
 0x207   :  { %2830 = vmatprep.subr.bf16.mxu1 %v2829_v48  ;;  %2860 = vmatpush3.bf16.msra.mxu0 %v2859_v30  ;;  %v1707_v30 = vld [vmem:[#allocation8 + $0x1e8] sm:$0xff] }
 0x208   :  { %2862 = vmatprep.subr.bf16.mxu0 %v2861_v60  ;;  %v1659_v60 = vld [vmem:[#allocation8 + $0x68] sm:$0xff]  ;;  %v2901_v0 = vpack.c.bf16 %v1707_v30, %v1706_v58  ;;  %v1716_v58 = vld [vmem:[#allocation8 + $0x230] sm:$0xff]  ;;  %v1717_v30 = vld [vmem:[#allocation8 + $0x238] sm:$0xff] }
 0x209   :  { %v2871_v62 = vpack.c.bf16 %v1659_v60, %v1658_v59  ;;  %v2921_v59 = vpack.c.bf16 %v1717_v30, %v1716_v58  ;;  %v1718_v60 = vld [vmem:[#allocation8 + $0x240] sm:$0xff] }
 0x20a   :  { %2832 = vmatpush3.bf16.msra.mxu1 %v2829_v48  ;;  %v1689_v48 = vld [vmem:[#allocation8 + $0x158] sm:$0xff] }
 0x20b   :  { %2834 = vmatprep.subr.bf16.mxu1 %v2833_v6  ;;  %2864 = vmatpush3.bf16.msra.mxu0 %v2863_v7  ;;  %v2899_v61 = vpack.c.bf16 %v1689_v48, %v1688_v1  ;;  %v1677_v7 = vld [vmem:[#allocation8 + $0xf8] sm:$0xff]  ;;  %v2917_v48 = vpack.c.bf16 %v1715_v37, %v1714_v54 }
 0x20c   :  { %2866 = vmatprep.subr.bf16.mxu0 %v2865_v10  ;;  %v2873_v10 = vpack.c.bf16 %v1677_v7, %v1676_v14  ;;  %v1722_v14 = vld [vmem:[#allocation8 + $0x260] sm:$0xff]  ;;  %v1723_v7 = vld [vmem:[#allocation8 + $0x268] sm:$0xff] }
 0x20e   :  { %2836 = vmatpush3.bf16.msra.mxu1 %v2833_v6  ;;  %v1691_v6 = vld [vmem:[#allocation8 + $0x168] sm:$0xff] }
 0x20f   :  { %2838 = vmatprep.subr.bf16.mxu1 %v2837_v16  ;;  %2868 = vmatpush3.bf16.msra.mxu0 %v2867_v17  ;;  %v2903_v15 = vpack.c.bf16 %v1691_v6, %v1690_v2  ;;  %v2905_v17 = vpack.c.bf16 %v1709_v11, %v1708_v9  ;;  %v1721_v2 = vld [vmem:[#allocation8 + $0x258] sm:$0xff]  ;;  %v2933_v9 = vpack.c.bf16 %v1723_v7, %v1722_v14 }
 0x210   :  { %2870 = vmatprep.subr.bf16.mxu0 %v2869_v21  ;;  %v2907_v21 = vpack.c.bf16 %v1693_v3, %v1692_v18  ;;  %v1725_v11 = vld [vmem:[#allocation8 + $0x278] sm:$0xff] }
 0x212   :  { %2840 = vmatpush3.bf16.msra.mxu1 %v2837_v16  ;;  %v2875_v16 = vpack.c.bf16 %v1661_v13, %v1660_v12 }
 0x213   :  { %2842 = vmatprep.subr.bf16.mxu1 %v2841_v20  ;;  %2872 = vmatpush3.bf16.msra.mxu0 %v2871_v62 }
 0x214   :  { %2874 = vmatprep.subr.bf16.mxu0 %v2873_v10  ;;  %v1724_v10 = vld [vmem:[#allocation8 + $0x270] sm:$0xff] }
 0x215   :  { %v2937_v12 = vpack.c.bf16 %v1725_v11, %v1724_v10 }
 0x216   :  { %2844 = vmatpush3.bf16.msra.mxu1 %v2841_v20  ;;  %v1710_v20 = vld [vmem:[#allocation8 + $0x200] sm:$0xff] }
 0x217   :  { %2878 = vmatprep.subr.bf16.mxu1 %v2877_v24  ;;  %2876 = vmatpush3.bf16.msra.mxu0 %v2875_v16  ;;  %v2909_v47 = vpack.c.bf16 %v1711_v23, %v1710_v20  ;;  %v920_v24 = vld [vmem:[#allocation10 + $0x1] ss:$8 sm:$0xf] }
 0x218   :  { %v3347_v27 = vor.u32 %v921_v25, %v920_v24 }
 0x219   :  { %2232 = vmatmul.mubr.f32.vlgmr.msra.gmra.mrb[12].mxu1 %v3329_v51  ;;  %v2893_v51 = vpack.c.bf16 %v1703_v50, %v1702_v31  ;;  %2910 = vmatprep.subr.bf16.mxu0 %v2909_v47 }
 0x21a   :  { %2880 = vmatpush3.bf16.msra.mxu1 %v2879_v29  ;;  %v927_v28 = vrot.slane %v3347_v27, %v257_v4  ;;  %v935_v42 = vrot.slane %v3347_v27, %v265_v39  ;;  %v931_v29 = vrot.slane %v3347_v27, %v261_v5  ;;  %v1713_v4 = vld [vmem:[#allocation8 + $0x218] sm:$0xff] }
 0x21b   :  { %2882 = vmatprep.subr.bf16.mxu1 %v2881_v32  ;;  %v939_v32 = vrot.slane %v3347_v27, %v269_v8  ;;  %v2913_v46 = vpack.c.bf16 %v1713_v4, %v1712_v41  ;;  %v1726_v41 = vld [vmem:[#allocation10 + $0x2] ss:$0 sm:$0xff] }
 0x21e   :  { %2884 = vmatpush3.bf16.msra.mxu1 %v2883_v36 }
 0x21f   :  { %2886 = vmatprep.subr.bf16.mxu1 %v2885_v40 }
 0x222   :  { %2888 = vmatpush3.bf16.msra.mxu1 %v2887_v22 }
 0x223   :  { %2890 = vmatprep.subr.bf16.mxu1 %v2889_v45 }
 0x226   :  { %2892 = vmatpush3.bf16.msra.mxu1 %v2891_v38 }
 0x227   :  { %2894 = vmatprep.subr.bf16.mxu1 %v2893_v51 }
 0x22a   :  { %2896 = vmatpush3.bf16.msra.mxu1 %v2895_v56 }
 0x22b   :  { %2898 = vmatprep.subr.bf16.mxu1 %v2897_v57 }
 0x22e   :  { %2900 = vmatpush3.bf16.msra.mxu1 %v2899_v61  ;;  %v1719_v61 = vld [vmem:[#allocation8 + $0x248] sm:$0xff] }
 0x22f   :  { %2902 = vmatprep.subr.bf16.mxu1 %v2901_v0  ;;  %v2925_v62 = vpack.c.bf16 %v1719_v61, %v1718_v60  ;;  %v1720_v0 = vld [vmem:[#allocation8 + $0x250] sm:$0xff] }
 0x230   :  { %v2929_v6 = vpack.c.bf16 %v1721_v2, %v1720_v0 }
 0x232   :  { %2904 = vmatpush3.bf16.msra.mxu1 %v2903_v15  ;;  %v943_v15 = vrot.slane %v3347_v27, %v273_v53 }
 0x233   :  { %2906 = vmatprep.subr.bf16.mxu1 %v2905_v17 }
 0x236   :  { %2908 = vmatpush3.bf16.msra.mxu1 %v2907_v21 }
 0x2ab   :  { %v1169_v33 = vpop.f32.mrb[4].mxu1  ;;  %v1400_v34 = vpop.f32.mrb[8].mxu0 }
 0x2ac   :  { %v2941_v19 = vadd.f32 %v1169_v33, %v927_v28  ;;  %v2945_v35 = vadd.f32 %v1400_v34, %v935_v42  ;;  %v1171_v36 = vpop.f32.mrb[5].mxu1  ;;  %v1402_v40 = vpop.f32.mrb[9].mxu0 }
 0x2ad   :  { %v2942_v49 = vadd.f32 %v1171_v36, %v931_v29  ;;  %v2946_v44 = vadd.f32 %v1402_v40, %v939_v32 }
 0x2ae   :  { %v1636_v5 = vmax.f32 %v2941_v19, 0.0  ;;  %v1638_v43 = vmax.f32 %v2945_v35, 0.0 }
 0x2af   :  { %v1637_v26 = vmax.f32 %v2942_v49, 0.0  ;;  %v1639_v39 = vmax.f32 %v2946_v44, 0.0  ;;  %v1175_v22 = vpop.f32.mrb[6].mxu1  ;;  %v1406_v45 = vpop.f32.mrb[10].mxu0 }
 0x2b0   :  { %v2943_v31 = vadd.f32 %v1175_v22, %v927_v28  ;;  %v2947_v50 = vadd.f32 %v1406_v45, %v935_v42  ;;  %v1177_v8 = vpop.f32.mrb[7].mxu1  ;;  %v1408_v38 = vpop.f32.mrb[11].mxu0 }
 0x2b1   :  { %v2944_v51 = vadd.f32 %v1177_v8, %v931_v29  ;;  %v2948_v52 = vadd.f32 %v1408_v38, %v939_v32  ;;  %1791 = vmatprep.mubr.f32.mxu0 %v1637_v26  ;;  %1866 = vmatprep.mubr.f32.mxu1 %v1639_v39 }
 0x2b2   :  { %1792 = vmatmul.mubr.f32.vlgmr.msra.gmra.mrb[16].mxu0 %v1636_v5  ;;  %1867 = vmatmul.mubr.f32.vlgmr.msra.gmra.mrb[14].mxu1 %v1638_v43  ;;  %v1641_v57 = vmax.f32 %v2943_v31, 0.0  ;;  %v1643_v1 = vmax.f32 %v2947_v50, 0.0 }
 0x2b3   :  { %v1642_v55 = vmax.f32 %v2944_v51, 0.0  ;;  %v1644_v56 = vmax.f32 %v2948_v52, 0.0  ;;  %2912 = vmatpush3.bf16.msra.mxu0 %v2909_v47 }
 0x2b4   :  { %2914 = vmatprep.subr.bf16.mxu0 %v2913_v46 }
 0x2b5   :  { %1796 = vmatprep.mubr.f32.mxu0 %v1642_v55  ;;  %1871 = vmatprep.mubr.f32.mxu1 %v1644_v56 }
 0x2b6   :  { %1797 = vmatmul.mubr.f32.gmra.mrb[18].mxu0 %v1641_v57  ;;  %1872 = vmatmul.mubr.f32.gmra.mrb[16].mxu1 %v1643_v1 }
 0x2b7   :  { %2916 = vmatpush3.bf16.msra.mxu0 %v2913_v46 }
 0x2b8   :  { %2918 = vmatprep.subr.bf16.mxu0 %v2917_v48 }
 0x2bb   :  { %2920 = vmatpush3.bf16.msra.mxu0 %v2917_v48 }
 0x2bc   :  { %2922 = vmatprep.subr.bf16.mxu0 %v2921_v59 }
 0x2bf   :  { %2924 = vmatpush3.bf16.msra.mxu0 %v2921_v59 }
 0x2c0   :  { %2926 = vmatprep.subr.bf16.mxu0 %v2925_v62 }
 0x2c3   :  { %2928 = vmatpush3.bf16.msra.mxu0 %v2925_v62 }
 0x2c4   :  { %2930 = vmatprep.subr.bf16.mxu0 %v2929_v6 }
 0x2c7   :  { %2932 = vmatpush3.bf16.msra.mxu0 %v2929_v6 }
 0x2c8   :  { %2934 = vmatprep.subr.bf16.mxu0 %v2933_v9 }
 0x2cb   :  { %v2043_v13 = vpop.f32.mrb[8].mxu1  ;;  %2936 = vmatpush3.bf16.msra.mxu0 %v2933_v9 }
 0x2cc   :  { %v2081_v16 = vpop.f32.mrb[12].mxu0  ;;  %v2044_v17 = vpop.f32.mrb[9].mxu1  ;;  %2938 = vmatprep.subr.bf16.mxu0 %v2937_v12 }
 0x2cd   :  { %v2045_v18 = vadd.f32 %v2044_v17, %v2043_v13  ;;  %v2082_v3 = vpop.f32.mrb[13].mxu0 }
 0x2ce   :  { %v2083_v21 = vadd.f32 %v2082_v3, %v2081_v16 }
 0x2cf   :  { %v1478_v20 = vadd.f32 %v2045_v18, %v943_v15  ;;  %v2046_v23 = vpop.f32.mrb[10].mxu1  ;;  %2940 = vmatpush3.bf16.msra.mxu0 %v2937_v12 }
 0x2d0   :  { %v2084_v47 = vpop.f32.mrb[14].mxu0  ;;  %v2047_v24 = vpop.f32.mrb[11].mxu1 }
 0x2d1   :  { %v2048_v25 = vadd.f32 %v2047_v24, %v2046_v23  ;;  %v2085_v28 = vpop.f32.mrb[15].mxu0  ;;  %v1553_v42 = vadd.f32 %v2083_v21, %v1478_v20 }
 0x2d2   :  { %v2086_v29 = vadd.f32 %v2085_v28, %v2084_v47 }
 0x2d3   :  { %v1483_v32 = vadd.f32 %v2048_v25, %v943_v15 }
 0x2d5   :  { %v1558_v63 = vadd.f32 %v2086_v29, %v1483_v32 }
 0x2ec   :  { %v2233_v33 = vpop.f32.mrb[12].mxu1 }
 0x2ed   :  { %v1633_v53 = vadd.f32 %v2233_v33, %v1558_v63  ;;  %v1627_v27 = vpop.f32.mrb[13].mxu1 }
 0x2ee   :  { %v1628_v34 = vadd.f32 %v1627_v27, %v1553_v42 }
 0x2ef   :  { %v1645_v35 = vmax.f32 %v1633_v53, 0.0 }
 0x2f0   :  { %v1640_v19 = vmax.f32 %v1628_v34, 0.0 }
 0x2f2   :  { %2266 = vmatprep.mubr.f32.mxu0 %v1640_v19 }
 0x2f3   :  { %2267 = vmatmul.mubr.f32.vlgmr.msra.gmra.mrb[20].mxu0 %v1645_v35 }
 0x385   :  { %v2137_v36 = vpop.f32.mrb[16].mxu0  ;;  %v2175_v40 = vpop.f32.mrb[14].mxu1 }
 0x386   :  { %v2138_v4 = vpop.f32.mrb[17].mxu0  ;;  %v2176_v49 = vpop.f32.mrb[15].mxu1 }
 0x387   :  { %v2139_v44 = vadd.f32 %v2138_v4, %v2137_v36  ;;  %v2177_v26 = vadd.f32 %v2176_v49, %v2175_v40 }
 0x389   :  { %v1794_v39 = vadd.f32 %v2139_v44, %v1726_v41  ;;  %v2140_v22 = vpop.f32.mrb[18].mxu0  ;;  %v2178_v45 = vpop.f32.mrb[16].mxu1 }
 0x38a   :  { %v2141_v46 = vpop.f32.mrb[19].mxu0  ;;  %v2179_v5 = vpop.f32.mrb[17].mxu1 }
 0x38b   :  { %v2142_v43 = vadd.f32 %v2141_v46, %v2140_v22  ;;  %v2180_v31 = vadd.f32 %v2179_v5, %v2178_v45  ;;  %v1869_v50 = vadd.f32 %v2177_v26, %v1794_v39 }
 0x38d   :  { %v1799_v8 = vadd.f32 %v2142_v43, %v1726_v41 }
 0x38f   :  { %v1874_v38 = vadd.f32 %v2180_v31, %v1799_v8 }
 0x3c6   :  { %v2268_v51 = vpop.f32.mrb[20].mxu0 }
 0x3c7   :  { %v1949_v52 = vadd.f32 %v2268_v51, %v1874_v38  ;;  %v1943_v54 = vpop.f32.mrb[21].mxu0 }
 0x3c8   :  { %v1944_v37 = vadd.f32 %v1943_v54, %v1869_v50 }
 0x3c9   :  { %1953 = vst [vmem:[#allocation11 + $0x8] sm:$0xff] %v1949_v52 }
 0x3ca   :  { %1952 = vst [vmem:[#allocation11] sm:$0xff] %v1944_v37 }
 0x3cb   :  { %3099 = shalt.err (!%p3096_p2)
}
 0x3cc   :  { %s3100_s11 = scalar_lea.hbm %s3384_s5, 256 }
 0x3cd   :  { %p3101_p3 = scmp.ne.s32.totalorder %s3384_s5, %s3100_s11  ;;  %p3104_p4 = scmp.lt.u32.totalorder %s3100_s11, %s3384_s5 }
 0x3cf   :  { %p3106_p5 = pnand %p3104_p4, %p3101_p3 }
 0x3d1   :  { %3109 = shalt.err (!%p3106_p5)
}
 0x3d2   :  { %1965 = dma.vmem_to_hbm [thread:$0]  %s1960_s29, 256, %s3384_s5, [#allocation4], %s3122_s1, %s3122_s1, %s3123_s17  }
 0x3d3   :  { %3116 = dma.done.wait [#allocation4], 256  }
 0x3d4   :  { %3117 = vsyncadd [#allocation4], 4294967040 }
 0x3d5   :  { %1969 = vsyncpa [#allocation3], 1 }
 0x3d6   :  { %1970 = vsyncpa [#allocation6], 1 }
 0x3d7   :  { %1971 = vsyncpa [#allocation9], 1 }
 0x3d8   :  { %1972 = vsyncpa [#allocation4], 1 }

</bundles_post_ra>
